<compile_context>
chip_gen: v7x
topology: tpu7x:2x2x1
jax: 0.10.0
libtpu: 0.0.40
codegen_flags: <defaults>
</compile_context>

<pallas_src>
import jax
import jax.numpy as jnp
from jax import lax
from jax.experimental import pallas as pl
from jax.experimental.pallas import tpu as pltpu


# ---------------------------------------------------------------------------
# Layout helpers: NCHW <-> packed (B, H, W*C)  (channel fastest within a row)
# ---------------------------------------------------------------------------
def nchw_to_packed(x):
    B, C, H, W = x.shape
    return jnp.transpose(x, (0, 2, 3, 1)).reshape(B, H, W * C)


def packed_to_nchw(x, C):
    B, H, WC = x.shape
    W = WC // C
    return jnp.transpose(x.reshape(B, H, W, C), (0, 3, 1, 2))


# ---------------------------------------------------------------------------
# Trace-time weight packing (constants; folded by XLA under jit)
# ---------------------------------------------------------------------------
def _convT_width_weight(wt, W):
    """torch ConvTranspose2d weight (Cin, Cout, 2, 2) -> (2, W*Cin, 2*W*Cout).

    Bt[di][w*Cin + c, (2w' + dj)*Cout + oc] = wt[c, oc, di, dj] * (w == w')."""
    Cin, Cout = wt.shape[0], wt.shape[1]
    eye_w = jnp.eye(W, dtype=wt.dtype)
    wtd = jnp.transpose(wt, (2, 0, 3, 1))                 # (di, c, dj, oc)
    Bt = jnp.einsum("wv,dcjo->dwcvjo", eye_w, wtd)        # (di, w, c, w', dj, oc)
    return Bt.reshape(2, W * Cin, 2 * W * Cout)


def _conv3x3_width_weight(weight, cins, W):
    """torch Conv2d weight (Cout, sum(cins), 3, 3) -> (3*W*sum(cins), W*Cout).

    Width-banded (Toeplitz) form: row index = (operand j, dy, w', c), column
    index = (w, oc); entry = weight[oc, c, dy, w'-w+1] when |w'-w| <= 1 else 0
    (this also encodes the width zero-padding and the channel concat)."""
    Cout = weight.shape[0]
    # S[dx, w', w] = 1 iff w' == w + dx - 1
    S = jnp.stack([jnp.eye(W, k=1 - dx, dtype=weight.dtype) for dx in range(3)])
    slabs, c0 = [], 0
    for cj in cins:
        wj = weight[:, c0:c0 + cj, :, :]                  # (Cout, cj, 3, 3)
        wj = jnp.transpose(wj, (2, 3, 1, 0))              # (dy, dx, c, oc)
        Bj = jnp.einsum("xvw,yxco->yvcwo", S, wj)         # (dy, w', c, w, oc)
        slabs.append(Bj.reshape(3 * W * cj, W * Cout))
        c0 += cj
    return jnp.concatenate(slabs, axis=0)


# ---------------------------------------------------------------------------
# Kernel 1: ConvTranspose2d(k=2, s=2); writes the upsampled packed layout.
# ---------------------------------------------------------------------------
def _convT_kernel(x_ref, w_ref, b_ref, o_ref):
    # x_ref: (1, H, W*Cin); w_ref: (2, W*Cin, N); b_ref: (1, N); o_ref: (1, 2H, N)
    x = x_ref[0].astype(jnp.bfloat16)                      # bf16 MXU operand
    z0 = jnp.dot(x, w_ref[0], preferred_element_type=jnp.float32) + b_ref[...]
    z1 = jnp.dot(x, w_ref[1], preferred_element_type=jnp.float32) + b_ref[...]
    h, n = z0.shape
    # interleave even (di=0) / odd (di=1) output rows; lane dim stays fixed.
    y = jnp.stack([z0, z1], axis=1).reshape(2 * h, n)
    o_ref[0] = y.astype(o_ref.dtype)


def conv_transpose_2x2_s2(x_packed, wt, bt):
    """x_packed: (B, H, W*Cin). wt: (Cin, Cout, 2, 2). Returns (B, 2H, 2W*Cout)."""
    B, H, WCin = x_packed.shape
    Cin, Cout = int(wt.shape[0]), int(wt.shape[1])
    W = WCin // Cin
    N = 2 * W * Cout
    w2 = _convT_width_weight(wt, W).astype(jnp.bfloat16)   # (2, W*Cin, N)
    b_row = jnp.tile(bt, 2 * W).reshape(1, N).astype(jnp.float32)
    return pl.pallas_call(
        _convT_kernel,
        out_shape=jax.ShapeDtypeStruct((B, 2 * H, N), x_packed.dtype),
        grid=(B,),
        in_specs=[
            pl.BlockSpec((1, H, WCin), lambda b: (b, 0, 0)),
            pl.BlockSpec((2, W * Cin, N), lambda b: (0, 0, 0)),
            pl.BlockSpec((1, N), lambda b: (0, 0)),
        ],
        out_specs=pl.BlockSpec((1, 2 * H, N), lambda b: (b, 0, 0)),
        compiler_params=pltpu.CompilerParams(dimension_semantics=("parallel",)),
    )(x_packed, w2, b_row)


# ---------------------------------------------------------------------------
# Kernel 2: Conv2d(k=3, pad=1) + bias + ReLU over a (virtual) channel concat.
# One fat dot per grid step; height pad = in-register row shifts.
# ---------------------------------------------------------------------------
def _make_conv3x3_kernel(n_in):
    def kernel(*refs):
        x_refs = refs[:n_in]
        w_ref, b_ref, o_ref = refs[n_in], refs[n_in + 1], refs[n_in + 2]
        pieces = []
        for j in range(n_in):
            x = x_refs[j][0]                               # (H, W*Cj), f32
            zrow = jnp.zeros((1, x.shape[1]), x.dtype)
            pieces.append(jnp.concatenate([zrow, x[:-1, :]], axis=0))  # dy=0: x[h-1]
            pieces.append(x)                                            # dy=1: x[h]
            pieces.append(jnp.concatenate([x[1:, :], zrow], axis=0))   # dy=2: x[h+1]
        a = jnp.concatenate(pieces, axis=-1).astype(jnp.bfloat16)      # (H, 3*W*sum(Cj))
        acc = jnp.dot(a, w_ref[...], preferred_element_type=jnp.float32)
        acc = acc + b_ref[...]
        o_ref[0] = jnp.maximum(acc, 0.0).astype(o_ref.dtype)
    return kernel


def conv3x3_relu(xs_packed, cins, weight, bias):
    """Conv3x3(pad=1)+ReLU over the channel concat of packed inputs.

    xs_packed: list of (B, H, W*Cj) packed arrays (concat never hits HBM).
    weight: (Cout, sum(cins), 3, 3) torch layout. Returns (B, H, W*Cout) packed.
    """
    n_in = len(xs_packed)
    B, H, _ = xs_packed[0].shape
    Cout = int(weight.shape[0])
    W = int(xs_packed[0].shape[2]) // int(cins[0])
    for xp, cj in zip(xs_packed, cins):
        assert xp.shape == (B, H, W * cj), (xp.shape, cj)
    assert weight.shape == (Cout, sum(cins), 3, 3), weight.shape
    N = W * Cout

    w2 = _conv3x3_width_weight(weight, cins, W).astype(jnp.bfloat16)  # (3*W*ΣCj, N)
    b_row = jnp.tile(bias, W).reshape(1, N).astype(jnp.float32)

    in_specs = (
        [pl.BlockSpec((1, H, W * cj), lambda b: (b, 0, 0)) for cj in cins]
        + [pl.BlockSpec(w2.shape, lambda b: (0, 0)),
           pl.BlockSpec((1, N), lambda b: (0, 0))]
    )
    return pl.pallas_call(
        _make_conv3x3_kernel(n_in),
        out_shape=jax.ShapeDtypeStruct((B, H, N), xs_packed[0].dtype),
        grid=(B,),
        in_specs=in_specs,
        out_specs=pl.BlockSpec((1, H, N), lambda b: (b, 0, 0)),
        compiler_params=pltpu.CompilerParams(dimension_semantics=("parallel",)),
    )(*xs_packed, w2, b_row)


# ---------------------------------------------------------------------------
# DecoderBlock forward (NCHW in / NCHW out, matching the PyTorch module).
# Between kernels everything stays in the packed layout: no pads, no concats,
# no transposes in HBM.
# ---------------------------------------------------------------------------
def decoder_block_forward(inputs_nchw, skip_nchw, params):
    wt, bt, w1, b1, w2, b2 = params
    Ct = int(wt.shape[1])
    Cs = int(skip_nchw.shape[1])
    Cout = int(w2.shape[0])

    x_p = nchw_to_packed(inputs_nchw)                      # (B, H, W*Cin)
    up_p = conv_transpose_2x2_s2(x_p, wt, bt)              # (B, 2H, 2W*Ct) packed
    skip_p = nchw_to_packed(skip_nchw)                     # (B, 2H, 2W*Cs)
    h1 = conv3x3_relu([up_p, skip_p], [Ct, Cs], w1, b1)    # fused concat + conv1 + ReLU
    h2 = conv3x3_relu([h1], [int(w1.shape[0])], w2, b2)    # conv2 + ReLU
    return packed_to_nchw(h2, Cout)


# ---------------------------------------------------------------------------
# Pure-JAX reference (independent path, HIGHEST precision) for correctness.
# ---------------------------------------------------------------------------
def _reference_forward(inputs, skip, params):
    wt, bt, w1, b1, w2, b2 = params
    B, Cin, H, W = inputs.shape
    Cout = wt.shape[1]
    y = jnp.einsum(
        "bchw,cokl->bohkwl", inputs, wt, precision=lax.Precision.HIGHEST
    ).reshape(B, Cout, 2 * H, 2 * W) + bt[None, :, None, None]
    x = jnp.concatenate([y, skip], axis=1)

    def conv3(x, w, b):
        out = lax.conv_general_dilated(
            x, w, (1, 1), ((1, 1), (1, 1)),
            dimension_numbers=("NCHW", "OIHW", "NCHW"),
            precision=lax.Precision.HIGHEST,
        )
        return jnp.maximum(out + b[None, :, None, None], 0.0)

    return conv3(conv3(x, w1, b1), w2, b2)


if __name__ == "__main__":
    # DecoderBlock(in_channels=8, out_channels=4), 16x16 input -> 32x32 output
    B, Cin, H, W = 2, 8, 16, 16
    Cout = 4

    key = jax.random.PRNGKey(0)
    ks = jax.random.split(key, 8)
    inputs = jax.random.normal(ks[0], (B, Cin, H, W), jnp.float32)
    skip = jax.random.normal(ks[1], (B, Cout, 2 * H, 2 * W), jnp.float32)

    # deterministic synthetic parameters (torch layouts)
    wt = jax.random.normal(ks[2], (Cin, Cout, 2, 2), jnp.float32) * 0.25      # ConvTranspose2d
    bt = jax.random.normal(ks[3], (Cout,), jnp.float32) * 0.1
    w1 = jax.random.normal(ks[4], (Cout, 2 * Cout, 3, 3), jnp.float32) * 0.15  # Conv2d(2*Cout->Cout)
    b1 = jax.random.normal(ks[5], (Cout,), jnp.float32) * 0.1
    w2 = jax.random.normal(ks[6], (Cout, Cout, 3, 3), jnp.float32) * 0.15      # Conv2d(Cout->Cout)
    b2 = jax.random.normal(ks[7], (Cout,), jnp.float32) * 0.1
    params = (wt, bt, w1, b1, w2, b2)

    fwd = jax.jit(decoder_block_forward)
    out = jax.block_until_ready(fwd(inputs, skip, params))

    ref = _reference_forward(inputs, skip, params)
    abs_err = float(jnp.max(jnp.abs(out - ref)))
    rel_err = float(jnp.linalg.norm(out - ref) / jnp.linalg.norm(ref))
    assert out.shape == (B, Cout, 2 * H, 2 * W), out.shape
    # bf16 MXU operands + f32 accumulation vs a HIGHEST-precision f32 reference:
    # expected max-abs error ~1e-2 at these magnitudes; a structural bug would
    # be O(1) absolute / O(100%) relative.
    assert abs_err < 1e-1 and rel_err < 2e-2, (abs_err, rel_err)

    print("KERNEL_OK")
</pallas_src>

<mosaic_0001>
module attributes {stable_mosaic.version = 11 : i64} {
  func.func @_convT_kernel(%arg0: i32, %arg1: memref<1x16x128xf32, #tpu.memory_space<vmem>>, %arg2: memref<2x128x128xbf16, #tpu.memory_space<vmem>>, %arg3: memref<1x128xf32, #tpu.memory_space<vmem>>, %arg4: memref<1x32x128xf32, #tpu.memory_space<vmem>>) attributes {dimension_semantics = [#tpu.dimension_semantics<parallel>], iteration_bounds = array<i64: 2>, scalar_prefetch = 0 : i64, scratch_operands = 0 : i64, tpu.core_type = #tpu.core_type<tc>, window_params = [{transform_indices = @transform_0, window_bounds = array<i64: 1, 16, 128>}, {pipeline_mode = #tpu.pipeline_mode<synchronous>, transform_indices = @transform_1, window_bounds = array<i64: 2, 128, 128>}, {pipeline_mode = #tpu.pipeline_mode<synchronous>, transform_indices = @transform_2, window_bounds = array<i64: 1, 128>}, {transform_indices = @transform_3, window_bounds = array<i64: 1, 32, 128>}]} {
    %c0 = arith.constant 0 : index
    %c0_0 = arith.constant 0 : index
    %c0_1 = arith.constant 0 : index
    %0 = vector.load %arg1[%c0, %c0_0, %c0_1] : memref<1x16x128xf32, #tpu.memory_space<vmem>>, vector<1x16x128xf32>
    %1 = vector.shape_cast %0 : vector<1x16x128xf32> to vector<16x128xf32>
    %2 = arith.truncf %1 : vector<16x128xf32> to vector<16x128xbf16>
    %c0_2 = arith.constant 0 : index
    %c0_3 = arith.constant 0 : index
    %c0_4 = arith.constant 0 : index
    %3 = vector.load %arg2[%c0_2, %c0_3, %c0_4] : memref<2x128x128xbf16, #tpu.memory_space<vmem>>, vector<1x128x128xbf16>
    %4 = vector.shape_cast %3 : vector<1x128x128xbf16> to vector<128x128xbf16>
    %cst = arith.constant dense<0.000000e+00> : vector<16x128xf32>
    %5 = tpu.matmul %2, %4, %cst {dimension_numbers = #tpu.dot_dimension_numbers<[1], [0], [0], [1], [0, 0, 1, 1], [], []>} : vector<16x128xbf16>, vector<128x128xbf16>, vector<16x128xf32> -> vector<16x128xf32>
    %c0_5 = arith.constant 0 : index
    %c0_6 = arith.constant 0 : index
    %6 = vector.load %arg3[%c0_5, %c0_6] : memref<1x128xf32, #tpu.memory_space<vmem>>, vector<1x128xf32>
    %7 = vector.broadcast %6 : vector<1x128xf32> to vector<16x128xf32>
    %8 = arith.addf %5, %7 : vector<16x128xf32>
    %c1 = arith.constant 1 : index
    %c0_7 = arith.constant 0 : index
    %c0_8 = arith.constant 0 : index
    %9 = vector.load %arg2[%c1, %c0_7, %c0_8] : memref<2x128x128xbf16, #tpu.memory_space<vmem>>, vector<1x128x128xbf16>
    %10 = vector.shape_cast %9 : vector<1x128x128xbf16> to vector<128x128xbf16>
    %cst_9 = arith.constant dense<0.000000e+00> : vector<16x128xf32>
    %11 = tpu.matmul %2, %10, %cst_9 {dimension_numbers = #tpu.dot_dimension_numbers<[1], [0], [0], [1], [0, 0, 1, 1], [], []>} : vector<16x128xbf16>, vector<128x128xbf16>, vector<16x128xf32> -> vector<16x128xf32>
    %c0_10 = arith.constant 0 : index
    %c0_11 = arith.constant 0 : index
    %12 = vector.load %arg3[%c0_10, %c0_11] : memref<1x128xf32, #tpu.memory_space<vmem>>, vector<1x128xf32>
    %13 = vector.broadcast %12 : vector<1x128xf32> to vector<16x128xf32>
    %14 = arith.addf %11, %13 : vector<16x128xf32>
    %15 = vector.shape_cast %8 : vector<16x128xf32> to vector<16x1x128xf32>
    %16 = vector.shape_cast %14 : vector<16x128xf32> to vector<16x1x128xf32>
    %17 = tpu.concatenate %15, %16 in 1 : vector<16x1x128xf32>, vector<16x1x128xf32> -> vector<16x2x128xf32>
    %18 = vector.shape_cast %17 : vector<16x2x128xf32> to vector<32x128xf32>
    %c0_12 = arith.constant 0 : index
    %c0_13 = arith.constant 0 : index
    %c0_14 = arith.constant 0 : index
    %19 = vector.load %arg4[%c0_12, %c0_13, %c0_14] : memref<1x32x128xf32, #tpu.memory_space<vmem>>, vector<1x32x128xf32>
    %20 = vector.shape_cast %19 : vector<1x32x128xf32> to vector<32x128xf32>
    %21 = vector.shape_cast %18 : vector<32x128xf32> to vector<1x32x128xf32>
    tpu.vector_store %arg4[%c0_12, %c0_13, %c0_14], %21 {strides = array<i32>} : memref<1x32x128xf32, #tpu.memory_space<vmem>>, vector<1x32x128xf32>,
    return
  }
  func.func @transform_0(%arg0: i32) -> (i32, i32, i32) {
    %c0_i32 = arith.constant 0 : i32
    %c0_i32_0 = arith.constant 0 : i32
    %c0_i32_1 = arith.constant 0 : i32
    return %arg0, %c0_i32, %c0_i32_0 : i32, i32, i32
  }
  func.func @transform_1(%arg0: i32) -> (i32, i32, i32) {
    %c0_i32 = arith.constant 0 : i32
    %c0_i32_0 = arith.constant 0 : i32
    %c0_i32_1 = arith.constant 0 : i32
    %c0_i32_2 = arith.constant 0 : i32
    return %c0_i32, %c0_i32_0, %c0_i32_1 : i32, i32, i32
  }
  func.func @transform_2(%arg0: i32) -> (i32, i32) {
    %c0_i32 = arith.constant 0 : i32
    %c0_i32_0 = arith.constant 0 : i32
    %c0_i32_1 = arith.constant 0 : i32
    return %c0_i32, %c0_i32_0 : i32, i32
  }
  func.func @transform_3(%arg0: i32) -> (i32, i32, i32) {
    %c0_i32 = arith.constant 0 : i32
    %c0_i32_0 = arith.constant 0 : i32
    %c0_i32_1 = arith.constant 0 : i32
    return %arg0, %c0_i32, %c0_i32_0 : i32, i32, i32
  }
}

module attributes {stable_mosaic.version = 11 : i64} {
  func.func @kernel(%arg0: i32, %arg1: memref<1x32x128xf32, #tpu.memory_space<vmem>>, %arg2: memref<1x32x128xf32, #tpu.memory_space<vmem>>, %arg3: memref<768x128xbf16, #tpu.memory_space<vmem>>, %arg4: memref<1x128xf32, #tpu.memory_space<vmem>>, %arg5: memref<1x32x128xf32, #tpu.memory_space<vmem>>) attributes {dimension_semantics = [#tpu.dimension_semantics<parallel>], iteration_bounds = array<i64: 2>, scalar_prefetch = 0 : i64, scratch_operands = 0 : i64, tpu.core_type = #tpu.core_type<tc>, window_params = [{transform_indices = @transform_0, window_bounds = array<i64: 1, 32, 128>}, {transform_indices = @transform_1, window_bounds = array<i64: 1, 32, 128>}, {pipeline_mode = #tpu.pipeline_mode<synchronous>, transform_indices = @transform_2, window_bounds = array<i64: 768, 128>}, {pipeline_mode = #tpu.pipeline_mode<synchronous>, transform_indices = @transform_3, window_bounds = array<i64: 1, 128>}, {transform_indices = @transform_4, window_bounds = array<i64: 1, 32, 128>}]} {
    %c0 = arith.constant 0 : index
    %c0_0 = arith.constant 0 : index
    %c0_1 = arith.constant 0 : index
    %0 = vector.load %arg1[%c0, %c0_0, %c0_1] : memref<1x32x128xf32, #tpu.memory_space<vmem>>, vector<1x32x128xf32>
    %1 = vector.shape_cast %0 : vector<1x32x128xf32> to vector<32x128xf32>
    %cst = arith.constant 0.000000e+00 : f32
    %2 = vector.broadcast %cst : f32 to vector<1x128xf32>
    %3 = vector.extract_strided_slice %1 {offsets = [0, 0], sizes = [31, 128], strides = [1, 1]} : vector<32x128xf32> to vector<31x128xf32>
    %4 = tpu.concatenate %2, %3 in 0 : vector<1x128xf32>, vector<31x128xf32> -> vector<32x128xf32>
    %5 = vector.extract_strided_slice %1 {offsets = [1, 0], sizes = [31, 128], strides = [1, 1]} : vector<32x128xf32> to vector<31x128xf32>
    %6 = tpu.concatenate %5, %2 in 0 : vector<31x128xf32>, vector<1x128xf32> -> vector<32x128xf32>
    %c0_2 = arith.constant 0 : index
    %c0_3 = arith.constant 0 : index
    %c0_4 = arith.constant 0 : index
    %7 = vector.load %arg2[%c0_2, %c0_3, %c0_4] : memref<1x32x128xf32, #tpu.memory_space<vmem>>, vector<1x32x128xf32>
    %8 = vector.shape_cast %7 : vector<1x32x128xf32> to vector<32x128xf32>
    %cst_5 = arith.constant 0.000000e+00 : f32
    %9 = vector.broadcast %cst_5 : f32 to vector<1x128xf32>
    %10 = vector.extract_strided_slice %8 {offsets = [0, 0], sizes = [31, 128], strides = [1, 1]} : vector<32x128xf32> to vector<31x128xf32>
    %11 = tpu.concatenate %9, %10 in 0 : vector<1x128xf32>, vector<31x128xf32> -> vector<32x128xf32>
    %12 = vector.extract_strided_slice %8 {offsets = [1, 0], sizes = [31, 128], strides = [1, 1]} : vector<32x128xf32> to vector<31x128xf32>
    %13 = tpu.concatenate %12, %9 in 0 : vector<31x128xf32>, vector<1x128xf32> -> vector<32x128xf32>
    %14 = tpu.concatenate %4, %1, %6, %11, %8, %13 in 1 : vector<32x128xf32>, vector<32x128xf32>, vector<32x128xf32>, vector<32x128xf32>, vector<32x128xf32>, vector<32x128xf32> -> vector<32x768xf32>
    %15 = arith.truncf %14 : vector<32x768xf32> to vector<32x768xbf16>
    %c0_6 = arith.constant 0 : index
    %c0_7 = arith.constant 0 : index
    %16 = vector.load %arg3[%c0_6, %c0_7] : memref<768x128xbf16, #tpu.memory_space<vmem>>, vector<768x128xbf16>
    %cst_8 = arith.constant dense<0.000000e+00> : vector<32x128xf32>
    %17 = tpu.matmul %15, %16, %cst_8 {dimension_numbers = #tpu.dot_dimension_numbers<[1], [0], [0], [1], [0, 0, 1, 1], [], []>} : vector<32x768xbf16>, vector<768x128xbf16>, vector<32x128xf32> -> vector<32x128xf32>
    %c0_9 = arith.constant 0 : index
    %c0_10 = arith.constant 0 : index
    %18 = vector.load %arg4[%c0_9, %c0_10] : memref<1x128xf32, #tpu.memory_space<vmem>>, vector<1x128xf32>
    %19 = vector.broadcast %18 : vector<1x128xf32> to vector<32x128xf32>
    %20 = arith.addf %17, %19 : vector<32x128xf32>
    %cst_11 = arith.constant 0.000000e+00 : f32
    %21 = vector.broadcast %cst_11 : f32 to vector<32x128xf32>
    %22 = arith.maximumf %20, %21 : vector<32x128xf32>
    %c0_12 = arith.constant 0 : index
    %c0_13 = arith.constant 0 : index
    %c0_14 = arith.constant 0 : index
    %23 = vector.load %arg5[%c0_12, %c0_13, %c0_14] : memref<1x32x128xf32, #tpu.memory_space<vmem>>, vector<1x32x128xf32>
    %24 = vector.shape_cast %23 : vector<1x32x128xf32> to vector<32x128xf32>
    %25 = vector.shape_cast %22 : vector<32x128xf32> to vector<1x32x128xf32>
    tpu.vector_store %arg5[%c0_12, %c0_13, %c0_14], %25 {strides = array<i32>} : memref<1x32x128xf32, #tpu.memory_space<vmem>>, vector<1x32x128xf32>,
    return
  }
  func.func @transform_0(%arg0: i32) -> (i32, i32, i32) {
    %c0_i32 = arith.constant 0 : i32
    %c0_i32_0 = arith.constant 0 : i32
    %c0_i32_1 = arith.constant 0 : i32
    return %arg0, %c0_i32, %c0_i32_0 : i32, i32, i32
  }
  func.func @transform_1(%arg0: i32) -> (i32, i32, i32) {
    %c0_i32 = arith.constant 0 : i32
    %c0_i32_0 = arith.constant 0 : i32
    %c0_i32_1 = arith.constant 0 : i32
    return %arg0, %c0_i32, %c0_i32_0 : i32, i32, i32
  }
  func.func @transform_2(%arg0: i32) -> (i32, i32) {
    %c0_i32 = arith.constant 0 : i32
    %c0_i32_0 = arith.constant 0 : i32
    %c0_i32_1 = arith.constant 0 : i32
    return %c0_i32, %c0_i32_0 : i32, i32
  }
  func.func @transform_3(%arg0: i32) -> (i32, i32) {
    %c0_i32 = arith.constant 0 : i32
    %c0_i32_0 = arith.constant 0 : i32
    %c0_i32_1 = arith.constant 0 : i32
    return %c0_i32, %c0_i32_0 : i32, i32
  }
  func.func @transform_4(%arg0: i32) -> (i32, i32, i32) {
    %c0_i32 = arith.constant 0 : i32
    %c0_i32_0 = arith.constant 0 : i32
    %c0_i32_1 = arith.constant 0 : i32
    return %arg0, %c0_i32, %c0_i32_0 : i32, i32, i32
  }
}

module attributes {stable_mosaic.version = 11 : i64} {
  func.func @kernel(%arg0: i32, %arg1: memref<1x32x128xf32, #tpu.memory_space<vmem>>, %arg2: memref<384x128xbf16, #tpu.memory_space<vmem>>, %arg3: memref<1x128xf32, #tpu.memory_space<vmem>>, %arg4: memref<1x32x128xf32, #tpu.memory_space<vmem>>) attributes {dimension_semantics = [#tpu.dimension_semantics<parallel>], iteration_bounds = array<i64: 2>, scalar_prefetch = 0 : i64, scratch_operands = 0 : i64, tpu.core_type = #tpu.core_type<tc>, window_params = [{transform_indices = @transform_0, window_bounds = array<i64: 1, 32, 128>}, {pipeline_mode = #tpu.pipeline_mode<synchronous>, transform_indices = @transform_1, window_bounds = array<i64: 384, 128>}, {pipeline_mode = #tpu.pipeline_mode<synchronous>, transform_indices = @transform_2, window_bounds = array<i64: 1, 128>}, {transform_indices = @transform_3, window_bounds = array<i64: 1, 32, 128>}]} {
    %c0 = arith.constant 0 : index
    %c0_0 = arith.constant 0 : index
    %c0_1 = arith.constant 0 : index
    %0 = vector.load %arg1[%c0, %c0_0, %c0_1] : memref<1x32x128xf32, #tpu.memory_space<vmem>>, vector<1x32x128xf32>
    %1 = vector.shape_cast %0 : vector<1x32x128xf32> to vector<32x128xf32>
    %cst = arith.constant 0.000000e+00 : f32
    %2 = vector.broadcast %cst : f32 to vector<1x128xf32>
    %3 = vector.extract_strided_slice %1 {offsets = [0, 0], sizes = [31, 128], strides = [1, 1]} : vector<32x128xf32> to vector<31x128xf32>
    %4 = tpu.concatenate %2, %3 in 0 : vector<1x128xf32>, vector<31x128xf32> -> vector<32x128xf32>
    %5 = vector.extract_strided_slice %1 {offsets = [1, 0], sizes = [31, 128], strides = [1, 1]} : vector<32x128xf32> to vector<31x128xf32>
    %6 = tpu.concatenate %5, %2 in 0 : vector<31x128xf32>, vector<1x128xf32> -> vector<32x128xf32>
    %7 = tpu.concatenate %4, %1, %6 in 1 : vector<32x128xf32>, vector<32x128xf32>, vector<32x128xf32> -> vector<32x384xf32>
    %8 = arith.truncf %7 : vector<32x384xf32> to vector<32x384xbf16>
    %c0_2 = arith.constant 0 : index
    %c0_3 = arith.constant 0 : index
    %9 = vector.load %arg2[%c0_2, %c0_3] : memref<384x128xbf16, #tpu.memory_space<vmem>>, vector<384x128xbf16>
    %cst_4 = arith.constant dense<0.000000e+00> : vector<32x128xf32>
    %10 = tpu.matmul %8, %9, %cst_4 {dimension_numbers = #tpu.dot_dimension_numbers<[1], [0], [0], [1], [0, 0, 1, 1], [], []>} : vector<32x384xbf16>, vector<384x128xbf16>, vector<32x128xf32> -> vector<32x128xf32>
    %c0_5 = arith.constant 0 : index
    %c0_6 = arith.constant 0 : index
    %11 = vector.load %arg3[%c0_5, %c0_6] : memref<1x128xf32, #tpu.memory_space<vmem>>, vector<1x128xf32>
    %12 = vector.broadcast %11 : vector<1x128xf32> to vector<32x128xf32>
    %13 = arith.addf %10, %12 : vector<32x128xf32>
    %cst_7 = arith.constant 0.000000e+00 : f32
    %14 = vector.broadcast %cst_7 : f32 to vector<32x128xf32>
    %15 = arith.maximumf %13, %14 : vector<32x128xf32>
    %c0_8 = arith.constant 0 : index
    %c0_9 = arith.constant 0 : index
    %c0_10 = arith.constant 0 : index
    %16 = vector.load %arg4[%c0_8, %c0_9, %c0_10] : memref<1x32x128xf32, #tpu.memory_space<vmem>>, vector<1x32x128xf32>
    %17 = vector.shape_cast %16 : vector<1x32x128xf32> to vector<32x128xf32>
    %18 = vector.shape_cast %15 : vector<32x128xf32> to vector<1x32x128xf32>
    tpu.vector_store %arg4[%c0_8, %c0_9, %c0_10], %18 {strides = array<i32>} : memref<1x32x128xf32, #tpu.memory_space<vmem>>, vector<1x32x128xf32>,
    return
  }
  func.func @transform_0(%arg0: i32) -> (i32, i32, i32) {
    %c0_i32 = arith.constant 0 : i32
    %c0_i32_0 = arith.constant 0 : i32
    %c0_i32_1 = arith.constant 0 : i32
    return %arg0, %c0_i32, %c0_i32_0 : i32, i32, i32
  }
  func.func @transform_1(%arg0: i32) -> (i32, i32) {
    %c0_i32 = arith.constant 0 : i32
    %c0_i32_0 = arith.constant 0 : i32
    %c0_i32_1 = arith.constant 0 : i32
    return %c0_i32, %c0_i32_0 : i32, i32
  }
  func.func @transform_2(%arg0: i32) -> (i32, i32) {
    %c0_i32 = arith.constant 0 : i32
    %c0_i32_0 = arith.constant 0 : i32
    %c0_i32_1 = arith.constant 0 : i32
    return %c0_i32, %c0_i32_0 : i32, i32
  }
  func.func @transform_3(%arg0: i32) -> (i32, i32, i32) {
    %c0_i32 = arith.constant 0 : i32
    %c0_i32_0 = arith.constant 0 : i32
    %c0_i32_1 = arith.constant 0 : i32
    return %arg0, %c0_i32, %c0_i32_0 : i32, i32, i32
  }
}

</mosaic_0001>

<bundles_post_ra>
// kernel: tile.18
= control target key start
LH: loop header
LB: loop body
LE: loop exit
PB: predicated region body
PF: predicated region fallthrough
CT: control target
= control target key end

     0   :  { %s40_s0 = inlined_call_operand.vmem [shape: f32[4], index: 0, kind: input, shape index: {}]   ;;  %s41_s1 = inlined_call_operand.vmem [shape: f32[32,4], index: 1, kind: output, shape index: {}]  }
   0x1   :  { %v4_v0 = vld [vmem:[%s40_s0] ss:$0 sm:$0xff] }
   0x2   :  { %5 = vst [vmem:[%s41_s1] sm:$0xff] %v4_v0  ;;  %12 = vst [vmem:[%s41_s1 + $0x8] sm:$0xff] %v4_v0 }
   0x3   :  { %13 = vst [vmem:[%s41_s1 + $0x10] sm:$0xff] %v4_v0  ;;  %14 = vst [vmem:[%s41_s1 + $0x18] sm:$0xff] %v4_v0 }

// kernel: tile.19
= control target key start
LH: loop header
LB: loop body
LE: loop exit
PB: predicated region body
PF: predicated region fallthrough
CT: control target
= control target key end

     0   :  { %s259_s10 = smov 124   ;;  %s260_s11 = smov 116   ;;  %vm3_vm0 = vcmask 31744   ;;  %vm9_vm1 = vcmask 1048544   ;;  %vm15_vm2 = vcmask 1015744   ;;  %vm21_vm3 = vcmask 982944   ;;  %s399_s0 = inlined_call_operand.vmem [shape: f32[32,4], index: 0, kind: input, shape index: {}]   ;;  %s400_s1 = inlined_call_operand.vmem [shape: f32[1,128], index: 1, kind: output, shape index: {}]  }
   0x1   :  { %v197_v0 = vld [vmem:[%s399_s0 + $0x1f] sm:$0x1]   ;;  %v199_v1 = vld [vmem:[%s399_s0 + $0x1d] sm:$0x1]   ;;  %v198_v2 = vld [vmem:[%s399_s0 + $0x1e] sm:$0x1]  }
   0x2   :  { %7 = vrot.lane.b32.xlu0 %v197_v0, %s259_s10  ;;  %19 = vrot.lane.b32.xlu1 %v199_v1, %s260_s11  ;;  %v200_v3 = vld [vmem:[%s399_s0 + $0x1c] sm:$0x1]   ;;  %s261_s16 = smov 120   ;;  %s262_s17 = smov 112   ;;  %v201_v4 = vld [vmem:[%s399_s0 + $0x1b] sm:$0x1]  }
   0x3   :  { %v202_v5 = vld [vmem:[%s399_s0 + $0x1a] sm:$0x1]   ;;  %s263_s22 = smov 108   ;;  %s264_s23 = smov 104   ;;  %v203_v6 = vld [vmem:[%s399_s0 + $0x19] sm:$0x1]  }
   0x4   :  { %v204_v7 = vld [vmem:[%s399_s0 + $0x18] sm:$0x1]   ;;  %s265_s28 = smov 100   ;;  %s266_s29 = smov 96   ;;  %v205_v8 = vld [vmem:[%s399_s0 + $0x17] sm:$0x1]  }
   0x5   :  { %v206_v9 = vld [vmem:[%s399_s0 + $0x16] sm:$0x1]   ;;  %v2_v10 = vld [vmem:[%s399_s0] sm:$0x1]   ;;  %s267_s7 = smov 92   ;;  %s268_s8 = smov 88  }
   0x6   :  { %13 = vrot.lane.b32.xlu0 %v198_v2, %s261_s16  ;;  %25 = vrot.lane.b32.xlu1 %v200_v3, %s262_s17  ;;  %4 = vst.msk [vmem:[#allocation0] sm:$0x1] %vm3_vm0, %v2_v10   ;;  %v207_v11 = vld [vmem:[%s399_s0 + $0x15] sm:$0x1]   ;;  %v208_v12 = vld [vmem:[%s399_s0 + $0x14] sm:$0x1]  }
   0x7   :  { %s269_s13 = smov 84   ;;  %s270_s14 = smov 80   ;;  %v209_v13 = vld [vmem:[%s399_s0 + $0x13] sm:$0x1]   ;;  %v210_v14 = vld [vmem:[%s399_s0 + $0x12] sm:$0x1]  }
   0x8   :  { %s271_s19 = smov 76   ;;  %s272_s20 = smov 72   ;;  %v211_v15 = vld [vmem:[%s399_s0 + $0x11] sm:$0x1]   ;;  %v212_v16 = vld [vmem:[%s399_s0 + $0x10] sm:$0x1]  }
   0x9   :  { %s273_s25 = smov 68   ;;  %s274_s26 = smov 64   ;;  %v213_v17 = vld [vmem:[%s399_s0 + $0xf] sm:$0x1]   ;;  %v214_v18 = vld [vmem:[%s399_s0 + $0xe] sm:$0x1]  }
   0xa   :  { %31 = vrot.lane.b32.xlu0 %v201_v4, %s263_s22  ;;  %37 = vrot.lane.b32.xlu1 %v202_v5, %s264_s23  ;;  %s275_s2 = smov 60   ;;  %s276_s3 = smov 56   ;;  %v215_v19 = vld [vmem:[%s399_s0 + $0xd] sm:$0x1]   ;;  %v216_v20 = vld [vmem:[%s399_s0 + $0xc] sm:$0x1]  }
   0xb   :  { %s278_s9 = smov 48   ;;  %v217_v21 = vld [vmem:[%s399_s0 + $0xb] sm:$0x1]   ;;  %v218_v22 = vld [vmem:[%s399_s0 + $0xa] sm:$0x1]   ;;  %s280_s15 = smov 40  }
   0xc   :  { %v219_v23 = vld [vmem:[%s399_s0 + $0x9] sm:$0x1]   ;;  %v220_v24 = vld [vmem:[%s399_s0 + $0x8] sm:$0x1]   ;;  %s282_s21 = smov 32   ;;  %s284_s27 = smov 24  }
   0xd   :  { %v221_v25 = vld [vmem:[%s399_s0 + $0x7] sm:$0x1]   ;;  %v222_v26 = vld [vmem:[%s399_s0 + $0x6] sm:$0x1]   ;;  %v223_v27 = vld [vmem:[%s399_s0 + $0x5] sm:$0x1]  }
   0xe   :  { %43 = vrot.lane.b32.xlu0 %v203_v6, %s265_s28  ;;  %49 = vrot.lane.b32.xlu1 %v204_v7, %s266_s29  ;;  %v224_v28 = vld [vmem:[%s399_s0 + $0x4] sm:$0x1]   ;;  %s286_s4 = smov 16   ;;  %v225_v29 = vld [vmem:[%s399_s0 + $0x3] sm:$0x1]   ;;  %s288_s10 = smov 8  }
   0xf   :  { %v226_v30 = vld [vmem:[%s399_s0 + $0x2] sm:$0x1]   ;;  %v227_v31 = vld [vmem:[%s399_s0 + $0x1] sm:$0x1]   ;;  %s289_s0 = smov 4   ;;  %vm27_vm4 = vcmask 950144  }
  0x10   :  { %vm33_vm5 = vcmask 917344   ;;  %vm39_vm6 = vcmask 884544   ;;  %vm45_vm7 = vcmask 851744   ;;  %vm51_vm8 = vcmask 818944  }
  0x11   :  { %vm57_vm9 = vcmask 786144   ;;  %vm63_vm10 = vcmask 753344   ;;  %vm69_vm11 = vcmask 720544   ;;  %vm75_vm12 = vcmask 687744  }
  0x12   :  { %55 = vrot.lane.b32.xlu0 %v205_v8, %s267_s7  ;;  %61 = vrot.lane.b32.xlu1 %v206_v9, %s268_s8  ;;  %s277_s8 = smov 52   ;;  %vm81_vm13 = vcmask 654944   ;;  %vm87_vm14 = vcmask 622144   ;;  %vm93_vm15 = vcmask 589344   ;;  %vm99_vm0 = vcmask 556544  }
  0x16   :  { %67 = vrot.lane.b32.xlu0 %v207_v11, %s269_s13  ;;  %73 = vrot.lane.b32.xlu1 %v208_v12, %s270_s14  ;;  %s279_s14 = smov 44  }
  0x1a   :  { %79 = vrot.lane.b32.xlu0 %v209_v13, %s271_s19  ;;  %85 = vrot.lane.b32.xlu1 %v210_v14, %s272_s20  ;;  %s281_s20 = smov 36  }
  0x1e   :  { %91 = vrot.lane.b32.xlu0 %v211_v15, %s273_s25  ;;  %97 = vrot.lane.b32.xlu1 %v212_v16, %s274_s26  ;;  %s283_s26 = smov 28  }
  0x22   :  { %103 = vrot.lane.b32.xlu0 %v213_v17, %s275_s2  ;;  %109 = vrot.lane.b32.xlu1 %v214_v18, %s276_s3  ;;  %s285_s3 = smov 20  }
  0x26   :  { %115 = vrot.lane.b32.xlu0 %v215_v19, %s277_s8  ;;  %121 = vrot.lane.b32.xlu1 %v216_v20, %s278_s9  ;;  %s287_s9 = smov 12  }
  0x2a   :  { %127 = vrot.lane.b32.xlu0 %v217_v21, %s279_s14  ;;  %133 = vrot.lane.b32.xlu1 %v218_v22, %s280_s15 }
  0x2e   :  { %139 = vrot.lane.b32.xlu0 %v219_v23, %s281_s20  ;;  %145 = vrot.lane.b32.xlu1 %v220_v24, %s282_s21 }
  0x32   :  { %151 = vrot.lane.b32.xlu0 %v221_v25, %s283_s26  ;;  %157 = vrot.lane.b32.xlu1 %v222_v26, %s284_s27 }
  0x36   :  { %163 = vrot.lane.b32.xlu0 %v223_v27, %s285_s3  ;;  %169 = vrot.lane.b32.xlu1 %v224_v28, %s286_s4 }
  0x3a   :  { %175 = vrot.lane.b32.xlu0 %v225_v29, %s287_s9  ;;  %181 = vrot.lane.b32.xlu1 %v226_v30, %s288_s10 }
  0x3e   :  { %187 = vrot.lane.b32.xlu0 %v227_v31, %s289_s0 }
  0x74   :  { %v8_v32 = vpop.permute.xlu0 %7   ;;  %v20_v33 = vpop.permute.xlu1 %19  }
  0x75   :  { %10 = vst.msk [vmem:[#allocation0] sm:$0x1] %vm9_vm1, %v8_v32   ;;  %vm105_vm1 = vcmask 523744  }
  0x78   :  { %v14_v34 = vpop.permute.xlu0 %13   ;;  %v26_v35 = vpop.permute.xlu1 %25  }
  0x79   :  { %16 = vst.msk [vmem:[#allocation0] sm:$0x1] %vm15_vm2, %v14_v34   ;;  %vm111_vm2 = vcmask 490944  }
  0x7a   :  { %22 = vst.msk [vmem:[#allocation0] sm:$0x1] %vm21_vm3, %v20_v33   ;;  %vm117_vm3 = vcmask 458144  }
  0x7b   :  { %28 = vst.msk [vmem:[#allocation0] sm:$0x1] %vm27_vm4, %v26_v35   ;;  %vm123_vm4 = vcmask 425344  }
  0x7c   :  { %v32_v36 = vpop.permute.xlu0 %31   ;;  %v38_v37 = vpop.permute.xlu1 %37  }
  0x7d   :  { %34 = vst.msk [vmem:[#allocation0] sm:$0x1] %vm33_vm5, %v32_v36   ;;  %vm129_vm5 = vcmask 392544  }
  0x7e   :  { %40 = vst.msk [vmem:[#allocation0] sm:$0x1] %vm39_vm6, %v38_v37   ;;  %vm135_vm6 = vcmask 359744  }
  0x80   :  { %v44_v38 = vpop.permute.xlu0 %43   ;;  %v50_v39 = vpop.permute.xlu1 %49  }
  0x81   :  { %46 = vst.msk [vmem:[#allocation0] sm:$0x1] %vm45_vm7, %v44_v38   ;;  %vm141_vm7 = vcmask 326944  }
  0x82   :  { %52 = vst.msk [vmem:[#allocation0] sm:$0x1] %vm51_vm8, %v50_v39   ;;  %vm147_vm8 = vcmask 294144  }
  0x84   :  { %v56_v40 = vpop.permute.xlu0 %55   ;;  %v62_v41 = vpop.permute.xlu1 %61  }
  0x85   :  { %58 = vst.msk [vmem:[#allocation0] sm:$0x1] %vm57_vm9, %v56_v40   ;;  %vm153_vm9 = vcmask 261344  }
  0x86   :  { %64 = vst.msk [vmem:[#allocation0] sm:$0x1] %vm63_vm10, %v62_v41   ;;  %vm159_vm10 = vcmask 228544  }
  0x88   :  { %v68_v42 = vpop.permute.xlu0 %67   ;;  %v74_v43 = vpop.permute.xlu1 %73  }
  0x89   :  { %70 = vst.msk [vmem:[#allocation0] sm:$0x1] %vm69_vm11, %v68_v42   ;;  %vm165_vm11 = vcmask 195744  }
  0x8a   :  { %76 = vst.msk [vmem:[#allocation0] sm:$0x1] %vm75_vm12, %v74_v43   ;;  %vm171_vm12 = vcmask 162944  }
  0x8c   :  { %v80_v44 = vpop.permute.xlu0 %79   ;;  %v86_v45 = vpop.permute.xlu1 %85  }
  0x8d   :  { %82 = vst.msk [vmem:[#allocation0] sm:$0x1] %vm81_vm13, %v80_v44   ;;  %vm177_vm13 = vcmask 130144  }
  0x8e   :  { %88 = vst.msk [vmem:[#allocation0] sm:$0x1] %vm87_vm14, %v86_v45   ;;  %vm183_vm14 = vcmask 97344  }
  0x90   :  { %v92_v46 = vpop.permute.xlu0 %91   ;;  %v98_v47 = vpop.permute.xlu1 %97  }
  0x91   :  { %94 = vst.msk [vmem:[#allocation0] sm:$0x1] %vm93_vm15, %v92_v46   ;;  %vm189_vm15 = vcmask 64544  }
  0x92   :  { %100 = vst.msk [vmem:[#allocation0] sm:$0x1] %vm99_vm0, %v98_v47  }
  0x94   :  { %v104_v48 = vpop.permute.xlu0 %103   ;;  %v110_v49 = vpop.permute.xlu1 %109  }
  0x95   :  { %106 = vst.msk [vmem:[#allocation0] sm:$0x1] %vm105_vm1, %v104_v48  }
  0x96   :  { %112 = vst.msk [vmem:[#allocation0] sm:$0x1] %vm111_vm2, %v110_v49  }
  0x98   :  { %v116_v50 = vpop.permute.xlu0 %115   ;;  %v122_v51 = vpop.permute.xlu1 %121  }
  0x99   :  { %118 = vst.msk [vmem:[#allocation0] sm:$0x1] %vm117_vm3, %v116_v50  }
  0x9a   :  { %124 = vst.msk [vmem:[#allocation0] sm:$0x1] %vm123_vm4, %v122_v51  }
  0x9c   :  { %v128_v52 = vpop.permute.xlu0 %127   ;;  %v134_v53 = vpop.permute.xlu1 %133  }
  0x9d   :  { %130 = vst.msk [vmem:[#allocation0] sm:$0x1] %vm129_vm5, %v128_v52  }
  0x9e   :  { %136 = vst.msk [vmem:[#allocation0] sm:$0x1] %vm135_vm6, %v134_v53  }
  0xa0   :  { %v140_v54 = vpop.permute.xlu0 %139   ;;  %v146_v55 = vpop.permute.xlu1 %145  }
  0xa1   :  { %142 = vst.msk [vmem:[#allocation0] sm:$0x1] %vm141_vm7, %v140_v54  }
  0xa2   :  { %148 = vst.msk [vmem:[#allocation0] sm:$0x1] %vm147_vm8, %v146_v55  }
  0xa4   :  { %v152_v56 = vpop.permute.xlu0 %151   ;;  %v158_v57 = vpop.permute.xlu1 %157  }
  0xa5   :  { %154 = vst.msk [vmem:[#allocation0] sm:$0x1] %vm153_vm9, %v152_v56  }
  0xa6   :  { %160 = vst.msk [vmem:[#allocation0] sm:$0x1] %vm159_vm10, %v158_v57  }
  0xa8   :  { %v164_v58 = vpop.permute.xlu0 %163   ;;  %v170_v59 = vpop.permute.xlu1 %169  }
  0xa9   :  { %166 = vst.msk [vmem:[#allocation0] sm:$0x1] %vm165_vm11, %v164_v58  }
  0xaa   :  { %172 = vst.msk [vmem:[#allocation0] sm:$0x1] %vm171_vm12, %v170_v59  }
  0xac   :  { %v176_v60 = vpop.permute.xlu0 %175   ;;  %v182_v61 = vpop.permute.xlu1 %181  }
  0xad   :  { %178 = vst.msk [vmem:[#allocation0] sm:$0x1] %vm177_vm13, %v176_v60  }
  0xae   :  { %184 = vst.msk [vmem:[#allocation0] sm:$0x1] %vm183_vm14, %v182_v61  }
  0xb0   :  { %v188_v62 = vpop.permute.xlu0 %187  }
  0xb1   :  { %190 = vst.msk [vmem:[#allocation0] sm:$0x1] %vm189_vm15, %v188_v62  }
  0xb8   :  { %v194_v63 = vld [vmem:[#allocation0] sm:$0x1] }
  0xb9   :  { %196 = vst [vmem:[%s400_s1] sm:$0x1] %v194_v63 }

// kernel: decoder_block_forward.3
= control target key start
LH: loop header
LB: loop body
LE: loop exit
PB: predicated region body
PF: predicated region fallthrough
CT: control target
= control target key end

     0   :  { %s1017_s12 = smov 0   ;;  %s1175_s0 = inlined_call_operand.vmem [shape: f32[2,16,128], index: 0, kind: input, shape index: {}]   ;;  %s1176_s1 = inlined_call_operand.vmem [shape: bf16[2,128,128], index: 1, kind: input, shape index: {}]   ;;  %s1177_s2 = inlined_call_operand.vmem [shape: f32[1,128], index: 2, kind: input, shape index: {}]   ;;  %s1178_s3 = inlined_call_operand.vmem [shape: f32[2,32,128], index: 3, kind: output, shape index: {}]  }
   0x1 LB: > { %s853_s13 = sadd.s32 4294967295, %s991_s12   ;;  %p857_p0 = scmp.ge.s32.totalorder %s991_s12, 1  ;;  %s991_s12 = sphi %s1017_s12, %s13_s12  }
   0x2   : > { %p137_p1 = scmp.lt.s32.totalorder %s991_s12, 3 }
   0x4   : > { %p138_p2 = pnand %p857_p0, %p137_p1 }
   0x5   : > { %v969_v0 = vld [vmem:[%s1176_s1] sm:$0xff] (!%p138_p2)   ;;  %v993_v1 = vmov (!%p138_p2), 0.0   ;;  %v971_v3 = vld [vmem:[%s1176_s1 + $0x8] sm:$0xff] (!%p138_p2)   ;;  %vm994_vm0 = vmmov (!%p138_p2), 0   ;;  %v973_v5 = vld [vmem:[%s1176_s1 + $0x10] sm:$0xff] (!%p138_p2)   ;;  %p161_p3 = scmp.lt.s32.totalorder (!%p138_p2), %s853_s13, 1  ;;  %v399_v22 = vlaneseq (!%p138_p2) }
   0x6   : > { %141 = sbr.rel (%p138_p2) target bundleno = 285 (0x11d), region = 32  ;;  %917 = vmatprep.subr.bf16.mxu0 (!%p138_p2), %v993_v1  ;;  %937 = vmatprep.subr.bf16.mxu1 (!%p138_p2), %v993_v1  ;;  %v970_v2 = vld [vmem:[%s1176_s1 + $0x40] sm:$0xff] (!%p138_p2)   ;;  %v972_v4 = vld [vmem:[%s1176_s1 + $0x48] sm:$0xff] (!%p138_p2)   ;;  %v974_v6 = vld [vmem:[%s1176_s1 + $0x50] sm:$0xff] (!%p138_p2)   ;;  %v995_v20 = vmov (!%p138_p2), 1966171168  }
   0x7   : > { %918 = vmatpush3.bf16.msra.mxu0 (!%p138_p2), %v969_v0  ;;  %933 = vmatprep.mubr.msk.bf16.mxu0 (!%p138_p2), %vm994_vm0, %v993_v1  ;;  %v975_v7 = vld [vmem:[%s1176_s1 + $0x18] sm:$0xff] (!%p138_p2)   ;;  %v977_v9 = vld [vmem:[%s1176_s1 + $0x20] sm:$0xff] (!%p138_p2)   ;;  %v979_v11 = vld [vmem:[%s1176_s1 + $0x28] sm:$0xff] (!%p138_p2)   ;;  %v397_v21 = vunpack.c.l.s4 (!%p138_p2), %v995_v20  ;;  %v400_v24 = vshrl.u32 (!%p138_p2), %v399_v22, 7  ;;  %v996_v25 = vmov (!%p138_p2), 1983009808  }
   0x8   : > { %938 = vmatpush3.bf16.msra.mxu1 (!%p138_p2), %v970_v2  ;;  %919 = vmatprep.subr.bf16.mxu0 (!%p138_p2), %v993_v1  ;;  %v976_v8 = vld [vmem:[%s1176_s1 + $0x58] sm:$0xff] (!%p138_p2)   ;;  %v978_v10 = vld [vmem:[%s1176_s1 + $0x60] sm:$0xff] (!%p138_p2)   ;;  %v980_v12 = vld [vmem:[%s1176_s1 + $0x68] sm:$0xff] (!%p138_p2)   ;;  %v725_v26 = vunpack.c.l.s4 (!%p138_p2), %v996_v25  ;;  %vm689_vm1 = vcmask (!%p138_p2), 1040384  }
   0x9   : > { %939 = vmatprep.subr.bf16.mxu1 (!%p138_p2), %v993_v1  ;;  %953 = vmatprep.mubr.msk.bf16.mxu1 (!%p138_p2), %vm994_vm0, %v993_v1  ;;  %v981_v13 = vld [vmem:[%s1176_s1 + $0x30] sm:$0xff] (!%p138_p2)   ;;  %v983_v15 = vld [vmem:[%s1176_s1 + $0x38] sm:$0xff] (!%p138_p2)   ;;  %v398_v23 = vunpack.c.0.s8 (!%p138_p2), %v397_v21  ;;  %v1086_v27 = vld [vmem:[%s1177_s2] ss:$0 sm:$0xff] (!%p138_p2)  ;;  %v1095_v44 = vsub.s32 (!%p138_p2), 0, %v400_v24 }
   0xa   : > { %v982_v14 = vld [vmem:[%s1176_s1 + $0x70] sm:$0xff] (!%p138_p2)   ;;  %v984_v18 = vld [vmem:[%s1176_s1 + $0x78] sm:$0xff] (!%p138_p2)   ;;  %v726_v32 = vunpack.c.0.s8 (!%p138_p2), %v725_v26 }
   0xb   : > { %920 = vmatpush3.bf16.msra.mxu0 (!%p138_p2), %v971_v3  ;;  %v1088_v29 = vsub.s32 (!%p138_p2), %v398_v23, %v400_v24 }
   0xc   : > { %940 = vmatpush3.bf16.msra.mxu1 (!%p138_p2), %v972_v4  ;;  %921 = vmatprep.subr.bf16.mxu0 (!%p138_p2), %v993_v1  ;;  %v1099_v49 = vsub.s32 (!%p138_p2), %v726_v32, %v400_v24 }
   0xd   : > { %941 = vmatprep.subr.bf16.mxu1 %v993_v1  ;;  %s1180_s13 = smov (!%p161_p3, %s853_s13), 1 }
   0xe   : > { %s897_s11 = sshll.u32 %s1180_s13, 4  ;;  %s898_s27 = sshll.u32 %s1180_s13, 5 }
   0xf   : > { %922 = vmatpush3.bf16.msra.mxu0 %v973_v5  ;;  %s165_s20 = scalar_lea.vmem %s1175_s0, %s897_s11  ;;  %s1134_s30 = scalar_lea.vmem %s1178_s3, %s898_s27 }
  0x10   : > { %942 = vmatpush3.bf16.msra.mxu1 %v974_v6  ;;  %923 = vmatprep.subr.bf16.mxu0 %v993_v1  ;;  %v172_v16 = vld [vmem:[%s165_s20] sm:$0xff]  ;;  %v173_v17 = vld [vmem:[%s165_s20 + $0x8] sm:$0xff] }
  0x11   : > { %943 = vmatprep.subr.bf16.mxu1 %v993_v1  ;;  %v174_v19 = vpack.c.bf16 %v173_v17, %v172_v16 }
  0x13   : > { %924 = vmatpush3.bf16.msra.mxu0 %v975_v7 }
  0x14   : > { %944 = vmatpush3.bf16.msra.mxu1 %v976_v8  ;;  %925 = vmatprep.subr.bf16.mxu0 %v993_v1 }
  0x15   : > { %945 = vmatprep.subr.bf16.mxu1 %v993_v1 }
  0x17   : > { %926 = vmatpush3.bf16.msra.mxu0 %v977_v9 }
  0x18   : > { %946 = vmatpush3.bf16.msra.mxu1 %v978_v10  ;;  %927 = vmatprep.subr.bf16.mxu0 %v993_v1 }
  0x19   : > { %947 = vmatprep.subr.bf16.mxu1 %v993_v1 }
  0x1b   : > { %928 = vmatpush3.bf16.msra.mxu0 %v979_v11 }
  0x1c   : > { %948 = vmatpush3.bf16.msra.mxu1 %v980_v12  ;;  %929 = vmatprep.subr.bf16.mxu0 %v993_v1 }
  0x1d   : > { %949 = vmatprep.subr.bf16.mxu1 %v993_v1 }
  0x1f   : > { %930 = vmatpush3.bf16.msra.mxu0 %v981_v13 }
  0x20   : > { %950 = vmatpush3.bf16.msra.mxu1 %v982_v14  ;;  %931 = vmatprep.subr.bf16.mxu0 %v993_v1 }
  0x21   : > { %951 = vmatprep.subr.bf16.mxu1 %v993_v1 }
  0x23   : > { %932 = vmatpush3.bf16.msra.mxu0 %v983_v15 }
  0x24   : > { %952 = vmatpush3.bf16.msra.mxu1 %v984_v18 }
  0x26   : > { %934 = vmatmul.mubr.bf16.vlgmr.msra.gmra.mrb[0].mxu0 %v174_v19 }
  0x27   : > { %954 = vmatmul.mubr.bf16.vlgmr.msra.gmra.mrb[0].mxu1 %v174_v19 }
  0xf9   : > { %v280_v28 = vpop.f32.mrb[0].mxu0 }
  0xfa   : > { %v281_v30 = vadd.f32 %v1086_v27, %v280_v28  ;;  %v386_v31 = vpop.f32.mrb[0].mxu1  ;;  %v935_v33 = vpop.f32.mrb[1].mxu0 }
  0xfb   : > { %v387_v34 = vadd.f32 %v1086_v27, %v386_v31  ;;  %v955_v35 = vpop.f32.mrb[1].mxu1  ;;  %v283_v36 = vpop.f32.mrb[2].mxu0 }
  0xfc   : > { %v395_v37 = vcombine.high %v281_v30, %v281_v30  ;;  %v402_v38 = vrot.slane %v281_v30, %v1088_v29  ;;  %v284_v39 = vadd.f32 %v1086_v27, %v283_v36  ;;  %v389_v40 = vpop.f32.mrb[2].mxu1  ;;  %v936_v41 = vpop.f32.mrb[3].mxu0 }
  0xfd   : > { %v511_v42 = vcombine.high %v387_v34, %v387_v34  ;;  %v518_v43 = vrot.slane %v387_v34, %v1088_v29  ;;  %v956_v45 = vpop.f32.mrb[3].mxu1  ;;  %v390_v25 = vadd.f32 %v1086_v27, %v389_v40 }
  0xfe   : > { %v409_v46 = vrot.slane %v395_v37, %v1088_v29  ;;  %v410_v47 = vcombine.high %v402_v38, %v402_v38  ;;  %v418_v48 = vrot.slane %v402_v38, %v1088_v29  ;;  %v444_v53 = vcombine.high %v284_v39, %v284_v39 }
  0xff   : > { %v525_v50 = vrot.slane %v511_v42, %v1088_v29  ;;  %v526_v51 = vcombine.high %v518_v43, %v518_v43  ;;  %v534_v52 = vrot.slane %v518_v43, %v1088_v29  ;;  %v451_v17 = vrot.slane %v284_v39, %v1088_v29 }
 0x100   : > { %v411_v54 = vcombine.high %v409_v46, %v409_v46  ;;  %v425_v55 = vrot.slane %v409_v46, %v1088_v29  ;;  %v432_v56 = vrot.slane %v410_v47, %v1088_v29  ;;  %v440_v57 = vcombine.high %v418_v48, %v418_v48 }
 0x101   : > { %v527_v58 = vcombine.high %v525_v50, %v525_v50  ;;  %v541_v59 = vrot.slane %v525_v50, %v1088_v29  ;;  %v548_v60 = vrot.slane %v526_v51, %v1088_v29  ;;  %v556_v61 = vcombine.high %v534_v52, %v534_v52 }
 0x102   : > { %v439_v62 = vrot.slane %v411_v54, %v1088_v29  ;;  %v441_v63 = vcombine.high %v425_v55, %v425_v55  ;;  %v442_v0 = vcombine.high %v432_v56, %v432_v56  ;;  %v612_v1 = vrot.slane %v534_v52, %v1095_v44 }
 0x103   : > { %v555_v2 = vrot.slane %v527_v58, %v1088_v29  ;;  %v557_v3 = vcombine.high %v541_v59, %v541_v59  ;;  %v558_v4 = vcombine.high %v548_v60, %v548_v60  ;;  %v616_v5 = vrot.slane %v548_v60, %v1095_v44 }
 0x104   : > { %v443_v6 = vcombine.high %v439_v62, %v439_v62  ;;  %v620_v7 = vrot.slane %v556_v61, %v1095_v44  ;;  %v628_v8 = vrot.slane %v541_v59, %v1095_v44  ;;  %v690_v9 = vsel %vm689_vm1, %v418_v48, %v612_v1 }
 0x105   : > { %v559_v10 = vcombine.high %v555_v2, %v555_v2  ;;  %v624_v11 = vrot.slane %v558_v4, %v1095_v44  ;;  %v632_v12 = vrot.slane %v555_v2, %v1095_v44  ;;  %v636_v13 = vrot.slane %v557_v3, %v1095_v44 }
 0x106   : > { %v691_v14 = vsel %vm689_vm1, %v432_v56, %v616_v5  ;;  %v692_v15 = vsel %vm689_vm1, %v440_v57, %v620_v7  ;;  %v694_v16 = vsel %vm689_vm1, %v425_v55, %v628_v8  ;;  %v458_v28 = vrot.slane %v444_v53, %v1088_v29 }
 0x107   : > { %v640_v18 = vrot.slane %v559_v10, %v1095_v44  ;;  %v693_v19 = vsel %vm689_vm1, %v442_v0, %v624_v11  ;;  %v695_v20 = vsel %vm689_vm1, %v439_v62, %v632_v12  ;;  %v696_v21 = vsel %vm689_vm1, %v441_v63, %v636_v13 }
 0x108   : > { %v722_v22 = vcombine.low %v690_v9, %v691_v14  ;;  %v723_v23 = vcombine.low %v692_v15, %v693_v19  ;;  %v739_v24 = vcombine.low %v694_v16, %v695_v20  ;;  %v459_v34 = vcombine.high %v451_v17, %v451_v17 }
 0x109   : > { %v697_v26 = vsel %vm689_vm1, %v443_v6, %v640_v18  ;;  %v560_v36 = vcombine.high %v390_v25, %v390_v25  ;;  %v567_v37 = vrot.slane %v390_v25, %v1088_v29  ;;  %v460_v38 = vcombine.high %v458_v28, %v458_v28 }
 0x10a   : > { %v730_v30 = vrot.slane %v722_v22, %v1099_v49  ;;  %v737_v31 = vrot.slane %v723_v23, %v1099_v49  ;;  %v740_v32 = vcombine.low %v696_v21, %v697_v26  ;;  %v747_v33 = vrot.slane %v739_v24, %v1099_v49 }
 0x10b   : > { %v467_v39 = vrot.slane %v451_v17, %v1088_v29  ;;  %v474_v40 = vrot.slane %v458_v28, %v1088_v29  ;;  %v574_v42 = vrot.slane %v560_v36, %v1088_v29  ;;  %v575_v43 = vcombine.high %v567_v37, %v567_v37 }
 0x10c   : > { %v738_v27 = vcombine.low %v730_v30, %v737_v31  ;;  %v754_v35 = vrot.slane %v740_v32, %v1099_v49  ;;  %v583_v45 = vrot.slane %v567_v37, %v1088_v29  ;;  %v481_v46 = vrot.slane %v459_v34, %v1088_v29 }
 0x10d   : > { %v576_v47 = vcombine.high %v574_v42, %v574_v42  ;;  %v590_v48 = vrot.slane %v574_v42, %v1088_v29  ;;  %v597_v50 = vrot.slane %v575_v43, %v1088_v29  ;;  %v488_v52 = vrot.slane %v460_v38, %v1088_v29 }
 0x10e   : > { %v755_v41 = vcombine.low %v747_v33, %v754_v35  ;;  %794 = vst [vmem:[%s1134_s30] sm:$0xff] %v738_v27  ;;  %v605_v51 = vcombine.high %v583_v45, %v583_v45  ;;  %v489_v53 = vcombine.high %v467_v39, %v467_v39  ;;  %v490_v54 = vcombine.high %v474_v40, %v474_v40 }
 0x10f   : > { %v644_v55 = vrot.slane %v583_v45, %v1095_v44  ;;  %v604_v56 = vrot.slane %v576_v47, %v1088_v29  ;;  %v606_v57 = vcombine.high %v590_v48, %v590_v48  ;;  %v607_v58 = vcombine.high %v597_v50, %v597_v50 }
 0x110   : > { %795 = vst [vmem:[%s1134_s30 + $0x8] sm:$0xff] %v755_v41  ;;  %v648_v59 = vrot.slane %v597_v50, %v1095_v44  ;;  %v491_v60 = vcombine.high %v481_v46, %v481_v46  ;;  %v652_v61 = vrot.slane %v605_v51, %v1095_v44  ;;  %v660_v62 = vrot.slane %v590_v48, %v1095_v44 }
 0x111   : > { %v698_v63 = vsel %vm689_vm1, %v467_v39, %v644_v55  ;;  %v608_v0 = vcombine.high %v604_v56, %v604_v56  ;;  %v656_v1 = vrot.slane %v607_v58, %v1095_v44  ;;  %v664_v2 = vrot.slane %v604_v56, %v1095_v44 }
 0x112   : > { %v668_v3 = vrot.slane %v606_v57, %v1095_v44  ;;  %v492_v4 = vcombine.high %v488_v52, %v488_v52  ;;  %v699_v29 = vsel %vm689_vm1, %v481_v46, %v648_v59  ;;  %v700_v5 = vsel %vm689_vm1, %v489_v53, %v652_v61 }
 0x113   : > { %v702_v6 = vsel %vm689_vm1, %v474_v40, %v660_v62  ;;  %v672_v7 = vrot.slane %v608_v0, %v1095_v44  ;;  %v701_v8 = vsel %vm689_vm1, %v491_v60, %v656_v1  ;;  %v703_v9 = vsel %vm689_vm1, %v488_v52, %v664_v2 }
 0x114   : > { %v704_v10 = vsel %vm689_vm1, %v490_v54, %v668_v3  ;;  %v756_v11 = vcombine.low %v698_v63, %v699_v29  ;;  %v757_v12 = vcombine.low %v700_v5, %v701_v8  ;;  %v773_v13 = vcombine.low %v702_v6, %v703_v9 }
 0x115   : > { %v705_v14 = vsel %vm689_vm1, %v492_v4, %v672_v7 }
 0x116   : > { %v764_v15 = vrot.slane %v756_v11, %v1099_v49  ;;  %v771_v16 = vrot.slane %v757_v12, %v1099_v49  ;;  %v774_v17 = vcombine.low %v704_v10, %v705_v14  ;;  %v781_v44 = vrot.slane %v773_v13, %v1099_v49 }
 0x118   : > { %v772_v18 = vcombine.low %v764_v15, %v771_v16  ;;  %v788_v19 = vrot.slane %v774_v17, %v1099_v49 }
 0x11a   : > { %v789_v20 = vcombine.low %v781_v44, %v788_v19  ;;  %796 = vst [vmem:[%s1134_s30 + $0x10] sm:$0xff] %v772_v18 }
 0x11c   : > { %797 = vst [vmem:[%s1134_s30 + $0x18] sm:$0xff] %v789_v20 }
 0x11d PF: > { %s13_s12 = sadd.s32 1, %s991_s12  }
 0x11e   : > { %p10_p4 = scmp.ge.s32.totalorder %s13_s12, 4  }
 0x120   :  { %12 = sbr.rel (!%p10_p4) target bundleno = 1 (0x1), region = 63 }

// kernel: decoder_block_forward.4
= control target key start
LH: loop header
LB: loop body
LE: loop exit
PB: predicated region body
PF: predicated region fallthrough
CT: control target
= control target key end

     0   :  { %s1180_s15 = smov 0   ;;  %s1402_s0 = inlined_call_operand.vmem [shape: f32[2,32,128], index: 0, kind: input, shape index: {}]   ;;  %s1403_s1 = inlined_call_operand.vmem [shape: f32[2,32,128], index: 1, kind: input, shape index: {}]   ;;  %s1404_s2 = inlined_call_operand.vmem [shape: bf16[768,128], index: 2, kind: input, shape index: {}]   ;;  %s1405_s3 = inlined_call_operand.vmem [shape: f32[1,128], index: 3, kind: input, shape index: {}]   ;;  %s1406_s4 = inlined_call_operand.vmem [shape: f32[2,32,128], index: 4, kind: output, shape index: {}]  }
   0x1 LB: > { %s910_s16 = sadd.s32 4294967295, %s1152_s15   ;;  %p914_p0 = scmp.ge.s32.totalorder %s1152_s15, 1  ;;  %s1152_s15 = sphi %s1180_s15, %s14_s15  }
   0x2   : > { %p172_p1 = scmp.lt.s32.totalorder %s1152_s15, 3 }
   0x4   : > { %p173_p2 = pnand %p914_p0, %p172_p1 }
   0x5   : > { %v1098_v0 = vld [vmem:[%s1404_s2 + $0x40] sm:$0xff] (!%p173_p2)   ;;  %v1102_v4 = vld [vmem:[%s1404_s2 + $0x48] sm:$0xff] (!%p173_p2)   ;;  %v1106_v8 = vld [vmem:[%s1404_s2 + $0x50] sm:$0xff] (!%p173_p2)   ;;  %p203_p3 = scmp.lt.s32.totalorder (!%p173_p2), %s910_s16, 1  ;;  %vm227_vm0 = vcmask (!%p173_p2), 1040384   ;;  %vm240_vm1 = vcmask (!%p173_p2), 1046528  }
   0x6   : > { %176 = sbr.rel (%p173_p2) target bundleno = 294 (0x126), region = 36  ;;  %v1099_v1 = vld [vmem:[%s1404_s2 + $0xc0] sm:$0xff] (!%p173_p2)   ;;  %989 = vmatprep.subr.bf16.mxu0 (!%p173_p2), %v1098_v0  ;;  %v1103_v5 = vld [vmem:[%s1404_s2 + $0xc8] sm:$0xff] (!%p173_p2)   ;;  %v1107_v9 = vld [vmem:[%s1404_s2 + $0xd0] sm:$0xff] (!%p173_p2)   ;;  %vm1154_vm3 = vmmov (!%p173_p2), 1  }
   0x7   : > { %v1100_v2 = vld [vmem:[%s1404_s2] sm:$0xff] (!%p173_p2)   ;;  %1017 = vmatprep.subr.bf16.mxu1 (!%p173_p2), %v1099_v1  ;;  %v1104_v6 = vld [vmem:[%s1404_s2 + $0x8] sm:$0xff] (!%p173_p2)   ;;  %v1108_v10 = vld [vmem:[%s1404_s2 + $0x10] sm:$0xff] (!%p173_p2)  }
   0x8   : > { %v1101_v3 = vld [vmem:[%s1404_s2 + $0x80] sm:$0xff] (!%p173_p2)   ;;  %990 = vmatpush3.bf16.msra.mxu0 (!%p173_p2), %v1100_v2  ;;  %v1105_v7 = vld [vmem:[%s1404_s2 + $0x88] sm:$0xff] (!%p173_p2)   ;;  %v1109_v11 = vld [vmem:[%s1404_s2 + $0x90] sm:$0xff] (!%p173_p2)  }
   0x9   : > { %1018 = vmatpush3.bf16.msra.mxu1 (!%p173_p2), %v1101_v3  ;;  %991 = vmatprep.subr.bf16.mxu0 (!%p173_p2), %v1102_v4  ;;  %v1110_v12 = vld [vmem:[%s1404_s2 + $0x58] sm:$0xff] (!%p173_p2)   ;;  %v1114_v16 = vld [vmem:[%s1404_s2 + $0x60] sm:$0xff] (!%p173_p2)   ;;  %v1118_v20 = vld [vmem:[%s1404_s2 + $0x68] sm:$0xff] (!%p173_p2)  }
   0xa   : > { %1019 = vmatprep.subr.bf16.mxu1 (!%p173_p2), %v1103_v5  ;;  %v1111_v13 = vld [vmem:[%s1404_s2 + $0xd8] sm:$0xff] (!%p173_p2)   ;;  %v1115_v17 = vld [vmem:[%s1404_s2 + $0xe0] sm:$0xff] (!%p173_p2)   ;;  %v1119_v21 = vld [vmem:[%s1404_s2 + $0xe8] sm:$0xff] (!%p173_p2)  }
   0xb   : > { %v1112_v14 = vld [vmem:[%s1404_s2 + $0x18] sm:$0xff] (!%p173_p2)   ;;  %v1116_v18 = vld [vmem:[%s1404_s2 + $0x20] sm:$0xff] (!%p173_p2)   ;;  %v1120_v22 = vld [vmem:[%s1404_s2 + $0x28] sm:$0xff] (!%p173_p2)  }
   0xc   : > { %992 = vmatpush3.bf16.msra.mxu0 (!%p173_p2), %v1104_v6  ;;  %v1113_v15 = vld [vmem:[%s1404_s2 + $0x98] sm:$0xff] (!%p173_p2)   ;;  %v1117_v19 = vld [vmem:[%s1404_s2 + $0xa0] sm:$0xff] (!%p173_p2)   ;;  %v1121_v23 = vld [vmem:[%s1404_s2 + $0xa8] sm:$0xff] (!%p173_p2)  }
   0xd   : > { %1020 = vmatpush3.bf16.msra.mxu1 %v1105_v7  ;;  %993 = vmatprep.subr.bf16.mxu0 %v1106_v8  ;;  %s1410_s16 = smov (!%p203_p3, %s910_s16), 1  ;;  %v1122_v24 = vld [vmem:[%s1404_s2 + $0x70] sm:$0xff]   ;;  %v1126_v28 = vld [vmem:[%s1404_s2 + $0x78] sm:$0xff]   ;;  %vm970_vm2 = vmneg %vm227_vm0 }
   0xe   : > { %1021 = vmatprep.subr.bf16.mxu1 %v1107_v9  ;;  %v1123_v25 = vld [vmem:[%s1404_s2 + $0xf0] sm:$0xff]   ;;  %s1273_s23 = sshll.u32 %s1410_s16, 5  ;;  %v1127_v29 = vld [vmem:[%s1404_s2 + $0xf8] sm:$0xff]   ;;  %v1130_v44 = vld [vmem:[%s1404_s2 + $0x140] sm:$0xff]  }
   0xf   : > { %v1124_v26 = vld [vmem:[%s1404_s2 + $0x30] sm:$0xff]   ;;  %s1288_s5 = scalar_lea.vmem %s1402_s0, %s1273_s23  ;;  %v1128_v30 = vld [vmem:[%s1404_s2 + $0x38] sm:$0xff]   ;;  %s1297_s10 = scalar_lea.vmem %s1403_s1, %s1273_s23  ;;  %vm971_vm4 = vmpackc.low %vm1154_vm3, %vm970_vm2 }
  0x10   : > { %994 = vmatpush3.bf16.msra.mxu0 %v1108_v10  ;;  %v1125_v27 = vld [vmem:[%s1404_s2 + $0xb0] sm:$0xff]   ;;  %v1129_v31 = vld [vmem:[%s1404_s2 + $0xb8] sm:$0xff]   ;;  %v219_v32 = vld [vmem:[%s1288_s5] sm:$0xff]  ;;  %s217_s28 = scalar_lea.vmem %s1406_s4, %s1273_s23 }
  0x11   : > { %1022 = vmatpush3.bf16.msra.mxu1 %v1109_v11  ;;  %995 = vmatprep.subr.bf16.mxu0 %v1110_v12  ;;  %v220_v33 = vld [vmem:[%s1288_s5 + $0x8] sm:$0xff]  ;;  %v221_v34 = vld [vmem:[%s1288_s5 + $0x10] sm:$0xff]  ;;  %v228_v35 = vrot.slane %v219_v32, 7  ;;  %v241_v37 = vrot.slane %v219_v32, 1  ;;  %v1306_v39 = vld [vmem:[%s1297_s10] sm:$0xff] }
  0x12   : > { %1023 = vmatprep.subr.bf16.mxu1 %v1111_v13  ;;  %v229_v36 = vrot.slane %v220_v33, 7  ;;  %v242_v38 = vrot.slane %v220_v33, 1  ;;  %v1309_v40 = vld [vmem:[%s1297_s10 + $0x8] sm:$0xff]  ;;  %v286_v41 = vpack.c.bf16 %v220_v33, %v219_v32  ;;  %v261_v42 = vrot.slane %v1306_v39, 7  ;;  %v1131_v50 = vld [vmem:[%s1404_s2 + $0x100] sm:$0xff]   ;;  %v1134_v56 = vld [vmem:[%s1404_s2 + $0x150] sm:$0xff]  }
  0x13   : > { %v262_v43 = vrot.slane %v1309_v40, 7  ;;  %v244_v47 = vrot.slane %v221_v34, 1  ;;  %v1132_v53 = vld [vmem:[%s1404_s2 + $0x148] sm:$0xff]   ;;  %v231_v57 = vrot.slane %v221_v34, 7  ;;  %v1135_v58 = vld [vmem:[%s1404_s2 + $0x110] sm:$0xff]   ;;  %v273_v59 = vrot.slane %v1306_v39, 1  ;;  %vm1358_vm5 = vmpackc.low %vm240_vm1, %vm1154_vm3 }
  0x14   : > { %996 = vmatpush3.bf16.msra.mxu0 %v1112_v14  ;;  %v230_v45 = vsel %vm227_vm0, %v228_v35, %v229_v36  ;;  %v243_v46 = vsel %vm240_vm1, %v241_v37, %v242_v38  ;;  %720 = vmatprep.mubr.bf16.mxu0 %v286_v41  ;;  %v1133_v55 = vld [vmem:[%s1404_s2 + $0x108] sm:$0xff]   ;;  %v1136_v60 = vld [vmem:[%s1404_s2 + $0x158] sm:$0xff]   ;;  %v274_v62 = vrot.slane %v1309_v40, 1  ;;  %v255_v3 = vld [vmem:[%s1297_s10 + $0x10] sm:$0xff] }
  0x15   : > { %1024 = vmatpush3.bf16.msra.mxu1 %v1113_v15  ;;  %997 = vmatprep.subr.bf16.mxu0 %v1114_v16  ;;  %v972_v48 = vpack.c.bf16 %v230_v45, %v228_v35  ;;  %v263_v49 = vsel %vm227_vm0, %v261_v42, %v262_v43  ;;  %v245_v52 = vsel %vm240_vm1, %v242_v38, %v244_v47  ;;  %v222_v61 = vld [vmem:[%s1288_s5 + $0x18] sm:$0xff]  ;;  %v264_v6 = vrot.slane %v255_v3, 7  ;;  %v1138_v10 = vld [vmem:[%s1404_s2 + $0x160] sm:$0xff]  }
  0x16   : > { %1025 = vmatprep.subr.bf16.mxu1 %v1115_v17  ;;  %v976_v51 = vpack.c.bf16 %v263_v49, %v261_v42  ;;  %v287_v54 = vpack.c.bf16 %v245_v52, %v243_v46  ;;  %v233_v63 = vrot.slane %v222_v61, 7  ;;  %v246_v0 = vrot.slane %v222_v61, 1  ;;  %v256_v4 = vld [vmem:[%s1297_s10 + $0x18] sm:$0xff] }
  0x17   : > { %v292_v1 = vpack.c.bf16 %v222_v61, %v221_v34  ;;  %v232_v2 = vsel %vm227_vm0, %v229_v36, %v231_v57  ;;  %v1137_v5 = vld [vmem:[%s1404_s2 + $0x118] sm:$0xff]   ;;  %v266_v7 = vrot.slane %v256_v4, 7  ;;  %v265_v12 = vsel %vm227_vm0, %v262_v43, %v264_v6  ;;  %v921_v34 = vld [vmem:[%s1405_s3] ss:$0 sm:$0xff] }
  0x18   : > { %998 = vmatpush3.bf16.msra.mxu0 %v1116_v18  ;;  %977 = vmatprep.mubr.msk.bf16.mxu1 %vm971_vm4, %v976_v51  ;;  %v234_v8 = vsel %vm227_vm0, %v231_v57, %v233_v63  ;;  %v247_v9 = vsel %vm240_vm1, %v244_v47, %v246_v0  ;;  %v275_v17 = vsel %vm240_vm1, %v273_v59, %v274_v62  ;;  %v276_v18 = vrot.slane %v255_v3, 1 }
  0x19   : > { %1026 = vmatpush3.bf16.msra.mxu1 %v1117_v19  ;;  %999 = vmatprep.subr.bf16.mxu0 %v1118_v20  ;;  %v291_v11 = vpack.c.bf16 %v234_v8, %v232_v2  ;;  %v267_v13 = vsel %vm227_vm0, %v264_v6, %v266_v7  ;;  %v979_v14 = vpack.c.bf16 %v246_v0, %v247_v9  ;;  %v278_v19 = vrot.slane %v256_v4, 1  ;;  %v1139_v20 = vld [vmem:[%s1404_s2 + $0x120] sm:$0xff]  }
  0x1a   : > { %1027 = vmatprep.subr.bf16.mxu1 %v1119_v21  ;;  %v294_v16 = vpack.c.bf16 %v267_v13, %v265_v12  ;;  %v277_v21 = vsel %vm240_vm1, %v274_v62, %v276_v18  ;;  %v295_v32 = vpack.c.bf16 %v256_v4, %v255_v3 }
  0x1c   : > { %1000 = vmatpush3.bf16.msra.mxu0 %v1120_v22  ;;  %v1140_v22 = vld [vmem:[%s1404_s2 + $0x168] sm:$0xff]  }
  0x1d   : > { %1028 = vmatpush3.bf16.msra.mxu1 %v1121_v23  ;;  %1001 = vmatprep.subr.bf16.mxu0 %v1122_v24  ;;  %v290_v23 = vpack.c.bf16 %v277_v21, %v275_v17  ;;  %v279_v24 = vsel %vm240_vm1, %v276_v18, %v278_v19 }
  0x1e   : > { %1029 = vmatprep.subr.bf16.mxu1 %v1123_v25  ;;  %v982_v25 = vpack.c.bf16 %v278_v19, %v279_v24 }
  0x20   : > { %1002 = vmatpush3.bf16.msra.mxu0 %v1124_v26  ;;  %v1141_v26 = vld [vmem:[%s1404_s2 + $0x128] sm:$0xff]  }
  0x21   : > { %1030 = vmatpush3.bf16.msra.mxu1 %v1125_v27  ;;  %1003 = vmatprep.subr.bf16.mxu0 %v1126_v28  ;;  %v1142_v27 = vld [vmem:[%s1404_s2 + $0x170] sm:$0xff]  }
  0x22   : > { %1031 = vmatprep.subr.bf16.mxu1 %v1127_v29  ;;  %v1143_v28 = vld [vmem:[%s1404_s2 + $0x130] sm:$0xff]   ;;  %v1144_v29 = vld [vmem:[%s1404_s2 + $0x178] sm:$0xff]  }
  0x24   : > { %1004 = vmatpush3.bf16.msra.mxu0 %v1128_v30  ;;  %v1145_v30 = vld [vmem:[%s1404_s2 + $0x138] sm:$0xff]  }
  0x25   : > { %1032 = vmatpush3.bf16.msra.mxu1 %v1129_v31  ;;  %1045 = vmatprep.subr.bf16.mxu0 %v1130_v44  ;;  %v289_v31 = vpack.c.bf16 %v1309_v40, %v1306_v39 }
  0x26   : > { %1073 = vmatprep.subr.bf16.mxu1 %v1130_v44 }
  0x27   : > { %973 = vmatmul.mubr.msk.bf16.vlgmr.msra.gmra.mrb[0].mxu0 %vm971_vm4, %v972_v48 }
  0x28   : > { %1046 = vmatpush3.bf16.msra.mxu0 %v1131_v50  ;;  %770 = vmatmul.mubr.bf16.vlgmr.msra.gmra.mrb[0].mxu1 %v287_v54 }
  0x29   : > { %1047 = vmatprep.subr.bf16.mxu0 %v1132_v53  ;;  %1081 = vmatpush3.bf16.msra.mxu1 %v1131_v50 }
  0x2a   : > { %1074 = vmatprep.subr.bf16.mxu1 %v1132_v53  ;;  %728 = vmatprep.mubr.bf16.mxu0 %v292_v1 }
  0x2b   : > { %777 = vmatprep.mubr.bf16.mxu1 %v294_v16 }
  0x2c   : > { %1048 = vmatpush3.bf16.msra.mxu0 %v1133_v55 }
  0x2d   : > { %1049 = vmatprep.subr.bf16.mxu0 %v1134_v56  ;;  %1082 = vmatpush3.bf16.msra.mxu1 %v1133_v55 }
  0x2e   : > { %1075 = vmatprep.subr.bf16.mxu1 %v1134_v56 }
  0x2f   : > { %729 = vmatmul.mubr.bf16.gmra.mrb[4].mxu0 %v291_v11 }
  0x30   : > { %1050 = vmatpush3.bf16.msra.mxu0 %v1135_v58  ;;  %980 = vmatmul.mubr.msk.bf16.gmra.mrb[4].mxu1 %vm1358_vm5, %v979_v14 }
  0x31   : > { %1051 = vmatprep.subr.bf16.mxu0 %v1136_v60  ;;  %1083 = vmatpush3.bf16.msra.mxu1 %v1135_v58 }
  0x32   : > { %1076 = vmatprep.subr.bf16.mxu1 %v1136_v60  ;;  %818 = vmatprep.mubr.bf16.mxu0 %v290_v23 }
  0x33   : > { %983 = vmatprep.mubr.msk.bf16.mxu1 %vm1358_vm5, %v982_v25 }
  0x34   : > { %1052 = vmatpush3.bf16.msra.mxu0 %v1137_v5 }
  0x35   : > { %1053 = vmatprep.subr.bf16.mxu0 %v1138_v10  ;;  %1084 = vmatpush3.bf16.msra.mxu1 %v1137_v5 }
  0x36   : > { %1077 = vmatprep.subr.bf16.mxu1 %v1138_v10 }
  0x38   : > { %1054 = vmatpush3.bf16.msra.mxu0 %v1139_v20 }
  0x39   : > { %1055 = vmatprep.subr.bf16.mxu0 %v1140_v22  ;;  %1085 = vmatpush3.bf16.msra.mxu1 %v1139_v20 }
  0x3a   : > { %1078 = vmatprep.subr.bf16.mxu1 %v1140_v22 }
  0x3c   : > { %1056 = vmatpush3.bf16.msra.mxu0 %v1141_v26 }
  0x3d   : > { %1057 = vmatprep.subr.bf16.mxu0 %v1142_v27  ;;  %1086 = vmatpush3.bf16.msra.mxu1 %v1141_v26 }
  0x3e   : > { %1079 = vmatprep.subr.bf16.mxu1 %v1142_v27 }
  0x40   : > { %1058 = vmatpush3.bf16.msra.mxu0 %v1143_v28 }
  0x41   : > { %1059 = vmatprep.subr.bf16.mxu0 %v1144_v29  ;;  %1087 = vmatpush3.bf16.msra.mxu1 %v1143_v28 }
  0x42   : > { %1080 = vmatprep.subr.bf16.mxu1 %v1144_v29 }
  0x44   : > { %1060 = vmatpush3.bf16.msra.mxu0 %v1145_v30 }
  0x45   : > { %1088 = vmatpush3.bf16.msra.mxu1 %v1145_v30 }
  0x47   : > { %819 = vmatmul.mubr.bf16.vlgmr.msra.gmra.mrb[8].mxu0 %v289_v31 }
  0x48   : > { %827 = vmatmul.mubr.bf16.vlgmr.msra.gmra.mrb[8].mxu1 %v295_v32 }
  0xfa   : > { %v1005_v33 = vpop.f32.mrb[0].mxu0 }
  0xfb   : > { %v1006_v35 = vpop.f32.mrb[1].mxu0  ;;  %v1033_v36 = vpop.f32.mrb[0].mxu1 }
  0xfc   : > { %v1007_v37 = vadd.f32 %v1006_v35, %v1005_v33  ;;  %v1008_v38 = vpop.f32.mrb[2].mxu0  ;;  %v1034_v41 = vpop.f32.mrb[1].mxu1 }
  0xfd   : > { %v1009_v42 = vpop.f32.mrb[3].mxu0  ;;  %v1035_v44 = vadd.f32 %v1034_v41, %v1033_v36  ;;  %v1036_v39 = vpop.f32.mrb[2].mxu1 }
  0xfe   : > { %v723_v43 = vadd.f32 %v1007_v37, %v921_v34  ;;  %v1010_v40 = vadd.f32 %v1009_v42, %v1008_v38  ;;  %v1037_v45 = vpop.f32.mrb[3].mxu1 }
  0xff   : > { %v1038_v48 = vadd.f32 %v1037_v45, %v1036_v39 }
 0x100   : > { %v772_v46 = vadd.f32 %v1035_v44, %v723_v43  ;;  %v726_v47 = vadd.f32 %v1010_v40, %v921_v34 }
 0x102   : > { %v775_v49 = vadd.f32 %v1038_v48, %v726_v47  ;;  %v1011_v50 = vpop.f32.mrb[4].mxu0 }
 0x103   : > { %v1012_v51 = vpop.f32.mrb[5].mxu0  ;;  %v1039_v54 = vpop.f32.mrb[4].mxu1 }
 0x104   : > { %v1013_v52 = vadd.f32 %v1012_v51, %v1011_v50  ;;  %v1014_v53 = vpop.f32.mrb[6].mxu0  ;;  %v1040_v56 = vpop.f32.mrb[5].mxu1 }
 0x105   : > { %v1015_v55 = vpop.f32.mrb[7].mxu0  ;;  %v1041_v59 = vadd.f32 %v1040_v56, %v1039_v54  ;;  %v1042_v60 = vpop.f32.mrb[6].mxu1 }
 0x106   : > { %v731_v57 = vadd.f32 %v1013_v52, %v921_v34  ;;  %v1016_v58 = vadd.f32 %v1015_v55, %v1014_v53  ;;  %v1043_v61 = vpop.f32.mrb[7].mxu1 }
 0x107   : > { %v1044_v0 = vadd.f32 %v1043_v61, %v1042_v60 }
 0x108   : > { %v734_v62 = vadd.f32 %v1016_v58, %v921_v34  ;;  %v780_v63 = vadd.f32 %v1041_v59, %v731_v57 }
 0x10a   : > { %v783_v1 = vadd.f32 %v1044_v0, %v734_v62 }
 0x11a   : > { %v1061_v2 = vpop.f32.mrb[8].mxu0 }
 0x11b   : > { %v1062_v3 = vpop.f32.mrb[9].mxu0  ;;  %v1067_v4 = vpop.f32.mrb[8].mxu1 }
 0x11c   : > { %v1063_v5 = vadd.f32 %v1062_v3, %v1061_v2  ;;  %v1064_v6 = vpop.f32.mrb[10].mxu0  ;;  %v1068_v7 = vpop.f32.mrb[9].mxu1 }
 0x11d   : > { %v1065_v8 = vpop.f32.mrb[11].mxu0  ;;  %v1069_v10 = vadd.f32 %v1068_v7, %v1067_v4  ;;  %v1070_v11 = vpop.f32.mrb[10].mxu1 }
 0x11e   : > { %v821_v9 = vadd.f32 %v1063_v5, %v772_v46  ;;  %v1066_v12 = vadd.f32 %v1065_v8, %v1064_v6  ;;  %v1071_v13 = vpop.f32.mrb[11].mxu1 }
 0x11f   : > { %v829_v15 = vadd.f32 %v1069_v10, %v780_v63  ;;  %v1072_v17 = vadd.f32 %v1071_v13, %v1070_v11 }
 0x120   : > { %v835_v14 = vmax.f32 %v821_v9, 0.0  ;;  %v824_v16 = vadd.f32 %v1066_v12, %v775_v49 }
 0x121   : > { %v837_v18 = vmax.f32 %v829_v15, 0.0  ;;  %v832_v20 = vadd.f32 %v1072_v17, %v783_v1 }
 0x122   : > { %839 = vst [vmem:[%s217_s28] sm:$0xff] %v835_v14  ;;  %v836_v19 = vmax.f32 %v824_v16, 0.0 }
 0x123   : > { %841 = vst [vmem:[%s217_s28 + $0x10] sm:$0xff] %v837_v18  ;;  %v838_v21 = vmax.f32 %v832_v20, 0.0 }
 0x124   : > { %840 = vst [vmem:[%s217_s28 + $0x8] sm:$0xff] %v836_v19 }
 0x125   : > { %842 = vst [vmem:[%s217_s28 + $0x18] sm:$0xff] %v838_v21 }
 0x126 PF: > { %s14_s15 = sadd.s32 1, %s1152_s15  }
 0x127   : > { %p11_p4 = scmp.ge.s32.totalorder %s14_s15, 4  }
 0x129   :  { %13 = sbr.rel (!%p11_p4) target bundleno = 1 (0x1), region = 69 }

// kernel: decoder_block_forward.5
= control target key start
LH: loop header
LB: loop body
LE: loop exit
PB: predicated region body
PF: predicated region fallthrough
CT: control target
= control target key end

     0   :  { %s737_s12 = smov 0   ;;  %s848_s0 = inlined_call_operand.vmem [shape: f32[2,32,128], index: 0, kind: input, shape index: {}]   ;;  %s849_s1 = inlined_call_operand.vmem [shape: bf16[384,128], index: 1, kind: input, shape index: {}]   ;;  %s850_s2 = inlined_call_operand.vmem [shape: f32[1,128], index: 2, kind: input, shape index: {}]   ;;  %s851_s3 = inlined_call_operand.vmem [shape: f32[2,32,128], index: 3, kind: output, shape index: {}]  }
   0x1 LB: > { %s572_s13 = sadd.s32 4294967295, %s714_s12   ;;  %p576_p0 = scmp.ge.s32.totalorder %s714_s12, 1  ;;  %s714_s12 = sphi %s737_s12, %s13_s12  }
   0x2   : > { %p137_p1 = scmp.lt.s32.totalorder %s714_s12, 3 }
   0x4   : > { %p138_p2 = pnand %p576_p0, %p137_p1 }
   0x5   : > { %v684_v0 = vld [vmem:[%s849_s1 + $0x40] sm:$0xff] (!%p138_p2)   ;;  %v686_v2 = vld [vmem:[%s849_s1 + $0x48] sm:$0xff] (!%p138_p2)   ;;  %v689_v5 = vld [vmem:[%s849_s1 + $0x50] sm:$0xff] (!%p138_p2)   ;;  %p161_p3 = scmp.lt.s32.totalorder (!%p138_p2), %s572_s13, 1  ;;  %vm180_vm0 = vcmask (!%p138_p2), 1040384   ;;  %vm193_vm1 = vcmask (!%p138_p2), 1046528  }
   0x6   : > { %141 = sbr.rel (%p138_p2) target bundleno = 270 (0x10e), region = 32  ;;  %v685_v1 = vld [vmem:[%s849_s1] sm:$0xff] (!%p138_p2)   ;;  %617 = vmatprep.subr.bf16.mxu0 (!%p138_p2), %v684_v0  ;;  %v688_v4 = vld [vmem:[%s849_s1 + $0x8] sm:$0xff] (!%p138_p2)   ;;  %v691_v7 = vld [vmem:[%s849_s1 + $0x10] sm:$0xff] (!%p138_p2)   ;;  %vm716_vm3 = vmmov (!%p138_p2), 1  }
   0x7   : > { %618 = vmatpush3.bf16.msra.mxu0 (!%p138_p2), %v685_v1  ;;  %v687_v3 = vld [vmem:[%s849_s1 + $0x80] sm:$0xff] (!%p138_p2)   ;;  %v690_v6 = vld [vmem:[%s849_s1 + $0x88] sm:$0xff] (!%p138_p2)   ;;  %v692_v8 = vld [vmem:[%s849_s1 + $0x58] sm:$0xff] (!%p138_p2)  }
   0x8   : > { %619 = vmatprep.subr.bf16.mxu0 (!%p138_p2), %v686_v2  ;;  %655 = vmatprep.subr.bf16.mxu1 (!%p138_p2), %v687_v3  ;;  %v693_v9 = vld [vmem:[%s849_s1 + $0x90] sm:$0xff] (!%p138_p2)   ;;  %v694_v10 = vld [vmem:[%s849_s1 + $0x18] sm:$0xff] (!%p138_p2)   ;;  %v695_v11 = vld [vmem:[%s849_s1 + $0x60] sm:$0xff] (!%p138_p2)  }
   0x9   : > { %656 = vmatpush3.bf16.msra.mxu1 (!%p138_p2), %v687_v3  ;;  %v696_v12 = vld [vmem:[%s849_s1 + $0x98] sm:$0xff] (!%p138_p2)   ;;  %v697_v13 = vld [vmem:[%s849_s1 + $0x20] sm:$0xff] (!%p138_p2)   ;;  %v698_v15 = vld [vmem:[%s849_s1 + $0x68] sm:$0xff] (!%p138_p2)  }
   0xa   : > { %657 = vmatprep.subr.bf16.mxu1 (!%p138_p2), %v690_v6  ;;  %v699_v14 = vld [vmem:[%s849_s1 + $0xa0] sm:$0xff] (!%p138_p2)   ;;  %v700_v16 = vld [vmem:[%s849_s1 + $0x28] sm:$0xff] (!%p138_p2)   ;;  %v701_v18 = vld [vmem:[%s849_s1 + $0x70] sm:$0xff] (!%p138_p2)  }
   0xb   : > { %620 = vmatpush3.bf16.msra.mxu0 (!%p138_p2), %v688_v4  ;;  %v702_v17 = vld [vmem:[%s849_s1 + $0xa8] sm:$0xff] (!%p138_p2)   ;;  %v703_v19 = vld [vmem:[%s849_s1 + $0x30] sm:$0xff] (!%p138_p2)   ;;  %v704_v20 = vld [vmem:[%s849_s1 + $0x78] sm:$0xff] (!%p138_p2)  }
   0xc   : > { %621 = vmatprep.subr.bf16.mxu0 (!%p138_p2), %v689_v5  ;;  %v705_v21 = vld [vmem:[%s849_s1 + $0xb0] sm:$0xff] (!%p138_p2)   ;;  %v706_v32 = vld [vmem:[%s849_s1 + $0x38] sm:$0xff] (!%p138_p2)   ;;  %vm606_vm2 = vmneg (!%p138_p2), %vm180_vm0 }
   0xd   : > { %658 = vmatpush3.bf16.msra.mxu1 %v690_v6  ;;  %s853_s13 = smov (!%p161_p3, %s572_s13), 1  ;;  %v707_v34 = vld [vmem:[%s849_s1 + $0xb8] sm:$0xff]   ;;  %vm607_vm4 = vmpackc.low %vm716_vm3, %vm606_vm2  ;;  %v581_v50 = vld [vmem:[%s850_s2] ss:$0 sm:$0xff] }
   0xe   : > { %659 = vmatprep.subr.bf16.mxu1 %v693_v9  ;;  %s615_s21 = sshll.u32 %s853_s13, 5  ;;  %vm610_vm5 = vmpackc.low %vm193_vm1, %vm716_vm3 }
   0xf   : > { %622 = vmatpush3.bf16.msra.mxu0 %v691_v7  ;;  %s165_s30 = scalar_lea.vmem %s848_s0, %s615_s21  ;;  %s170_s20 = scalar_lea.vmem %s851_s3, %s615_s21 }
  0x10   : > { %623 = vmatprep.subr.bf16.mxu0 %v692_v8  ;;  %v172_v22 = vld [vmem:[%s165_s30] sm:$0xff]  ;;  %v173_v23 = vld [vmem:[%s165_s30 + $0x8] sm:$0xff]  ;;  %v175_v24 = vld [vmem:[%s165_s30 + $0x18] sm:$0xff] }
  0x11   : > { %660 = vmatpush3.bf16.msra.mxu1 %v693_v9  ;;  %v181_v25 = vrot.slane %v172_v22, 7  ;;  %v182_v26 = vrot.slane %v173_v23, 7  ;;  %v194_v27 = vrot.slane %v172_v22, 1  ;;  %v195_v28 = vrot.slane %v173_v23, 1  ;;  %v174_v30 = vld [vmem:[%s165_s30 + $0x10] sm:$0xff] }
  0x12   : > { %661 = vmatprep.subr.bf16.mxu1 %v696_v12  ;;  %v207_v29 = vpack.c.bf16 %v173_v23, %v172_v22  ;;  %v199_v31 = vrot.slane %v175_v24, 1  ;;  %v197_v36 = vrot.slane %v174_v30, 1  ;;  %v210_v41 = vpack.c.bf16 %v175_v24, %v174_v30 }
  0x13   : > { %624 = vmatpush3.bf16.msra.mxu0 %v694_v10  ;;  %v183_v33 = vsel %vm180_vm0, %v181_v25, %v182_v26  ;;  %v196_v35 = vsel %vm193_vm1, %v194_v27, %v195_v28  ;;  %v184_v42 = vrot.slane %v174_v30, 7  ;;  %v186_v43 = vrot.slane %v175_v24, 7 }
  0x14   : > { %625 = vmatprep.subr.bf16.mxu0 %v695_v11  ;;  %443 = vmatprep.mubr.bf16.mxu0 %v207_v29  ;;  %v198_v37 = vsel %vm193_vm1, %v195_v28, %v197_v36  ;;  %v608_v38 = vpack.c.bf16 %v183_v33, %v181_v25  ;;  %v200_v40 = vsel %vm193_vm1, %v197_v36, %v199_v31 }
  0x15   : > { %662 = vmatpush3.bf16.msra.mxu1 %v696_v12  ;;  %v208_v39 = vpack.c.bf16 %v198_v37, %v196_v35  ;;  %v611_v44 = vpack.c.bf16 %v199_v31, %v200_v40  ;;  %v185_v45 = vsel %vm180_vm0, %v182_v26, %v184_v42  ;;  %v187_v46 = vsel %vm180_vm0, %v184_v42, %v186_v43 }
  0x16   : > { %663 = vmatprep.subr.bf16.mxu1 %v699_v14  ;;  %v209_v47 = vpack.c.bf16 %v187_v46, %v185_v45 }
  0x17   : > { %626 = vmatpush3.bf16.msra.mxu0 %v697_v13  ;;  %671 = vmatprep.mubr.bf16.mxu1 %v208_v39 }
  0x18   : > { %627 = vmatprep.subr.bf16.mxu0 %v698_v15 }
  0x19   : > { %664 = vmatpush3.bf16.msra.mxu1 %v699_v14 }
  0x1a   : > { %665 = vmatprep.subr.bf16.mxu1 %v702_v17 }
  0x1b   : > { %628 = vmatpush3.bf16.msra.mxu0 %v700_v16 }
  0x1c   : > { %629 = vmatprep.subr.bf16.mxu0 %v701_v18 }
  0x1d   : > { %666 = vmatpush3.bf16.msra.mxu1 %v702_v17 }
  0x1e   : > { %667 = vmatprep.subr.bf16.mxu1 %v705_v21 }
  0x1f   : > { %630 = vmatpush3.bf16.msra.mxu0 %v703_v19 }
  0x20   : > { %631 = vmatprep.subr.bf16.mxu0 %v704_v20 }
  0x21   : > { %668 = vmatpush3.bf16.msra.mxu1 %v705_v21 }
  0x22   : > { %669 = vmatprep.subr.bf16.mxu1 %v707_v34 }
  0x23   : > { %632 = vmatpush3.bf16.msra.mxu0 %v706_v32 }
  0x25   : > { %670 = vmatpush3.bf16.msra.mxu1 %v707_v34 }
  0x26   : > { %609 = vmatmul.mubr.msk.bf16.vlgmr.msra.gmra.mrb[0].mxu0 %vm607_vm4, %v608_v38 }
  0x27   : > { %451 = vmatprep.mubr.bf16.mxu0 %v210_v41 }
  0x28   : > { %672 = vmatmul.mubr.msk.bf16.vlgmr.msra.gmra.mrb[0].mxu1 %vm610_vm5, %v611_v44 }
  0x2e   : > { %452 = vmatmul.mubr.bf16.gmra.mrb[4].mxu0 %v209_v47 }
  0xf9   : > { %v633_v48 = vpop.f32.mrb[0].mxu0 }
  0xfa   : > { %v634_v49 = vpop.f32.mrb[1].mxu0 }
  0xfb   : > { %v635_v51 = vadd.f32 %v634_v49, %v633_v48  ;;  %v636_v52 = vpop.f32.mrb[2].mxu0  ;;  %v673_v54 = vpop.f32.mrb[0].mxu1 }
  0xfc   : > { %v637_v53 = vpop.f32.mrb[3].mxu0  ;;  %v494_v57 = vpop.f32.mrb[1].mxu1 }
  0xfd   : > { %v638_v55 = vadd.f32 %v637_v53, %v636_v52  ;;  %v446_v56 = vadd.f32 %v635_v51, %v581_v50  ;;  %v674_v58 = vpop.f32.mrb[2].mxu1 }
  0xfe   : > { %v497_v61 = vpop.f32.mrb[3].mxu1 }
  0xff   : > { %v495_v59 = vadd.f32 %v494_v57, %v446_v56  ;;  %v449_v60 = vadd.f32 %v638_v55, %v581_v50 }
 0x101   : > { %v509_v62 = vmax.f32 %v495_v59, 0.0  ;;  %v498_v63 = vadd.f32 %v497_v61, %v449_v60  ;;  %v639_v0 = vpop.f32.mrb[4].mxu0 }
 0x102   : > { %v640_v1 = vpop.f32.mrb[5].mxu0 }
 0x103   : > { %513 = vst [vmem:[%s170_s20] sm:$0xff] %v509_v62  ;;  %v510_v2 = vmax.f32 %v498_v63, 0.0  ;;  %v641_v3 = vadd.f32 %v640_v1, %v639_v0  ;;  %v642_v4 = vpop.f32.mrb[6].mxu0 }
 0x104   : > { %v643_v5 = vpop.f32.mrb[7].mxu0 }
 0x105   : > { %514 = vst [vmem:[%s170_s20 + $0x8] sm:$0xff] %v510_v2  ;;  %v454_v6 = vadd.f32 %v641_v3, %v581_v50  ;;  %v644_v7 = vadd.f32 %v643_v5, %v642_v4 }
 0x107   : > { %v503_v8 = vadd.f32 %v673_v54, %v454_v6  ;;  %v457_v9 = vadd.f32 %v644_v7, %v581_v50 }
 0x109   : > { %v511_v10 = vmax.f32 %v503_v8, 0.0  ;;  %v506_v11 = vadd.f32 %v674_v58, %v457_v9 }
 0x10b   : > { %515 = vst [vmem:[%s170_s20 + $0x10] sm:$0xff] %v511_v10  ;;  %v512_v12 = vmax.f32 %v506_v11, 0.0 }
 0x10d   : > { %516 = vst [vmem:[%s170_s20 + $0x18] sm:$0xff] %v512_v12 }
 0x10e PF: > { %s13_s12 = sadd.s32 1, %s714_s12  }
 0x10f   : > { %p10_p4 = scmp.ge.s32.totalorder %s13_s12, 4  }
 0x111   :  { %12 = sbr.rel (!%p10_p4) target bundleno = 1 (0x1), region = 62 }

</bundles_post_ra>
